<compile_context>
chip_gen: v6e
topology: v6e:2x2x1
jax: 0.10.0
libtpu: 0.0.40
codegen_flags: <defaults>
</compile_context>

<pallas_src>
import jax
import jax.numpy as jnp
from jax import lax
from jax.experimental import pallas as pl
from jax.experimental.pallas import tpu as pltpu


def _round_up(n, m):
    return ((n + m - 1) // m) * m


def _pad_gates_last(w, H, Hp):
    """Pad the trailing 4H axis (PyTorch gate blocks [i|f|g|o], each H wide) to 4*Hp."""
    lead = w.shape[:-1]
    w4 = w.reshape(lead + (4, H))
    pad = [(0, 0)] * len(lead) + [(0, 0), (0, Hp - H)]
    return jnp.pad(w4, pad).reshape(lead + (4 * Hp,))


def _choose_time_tile(T, BB, Hp, itemsize=4, budget=2 << 20, cap=16):
    """Largest divisor of T (<= cap) whose gates block fits the per-buffer budget."""
    best = 1
    for d in range(1, min(T, cap) + 1):
        if T % d == 0 and d * BB * 4 * Hp * itemsize <= budget:
            best = d
    return best


def bilstm_kernel(gx_ref,     # (TT, BB, 4Hp)  streamed per time-tile: x @ W_ih_f + b_f
                  whh_ref,    # (Hp, 4Hp)      forward recurrent weights (resident)
                  gb_ref,     # (BB, 4Hp)      x[:, -1] @ W_ih_b + b_b   (resident)
                  fcwf_ref,   # (Hp, Op)       fc weights, forward half   (resident)
                  fcwb_ref,   # (Hp, Op)       fc weights, backward half  (resident)
                  fcb_ref,    # (1, Op)        fc bias                    (resident)
                  out_ref,    # (BB, Op)       written only on the last time block
                  h_ref, c_ref):  # VMEM scratch (BB, Hp), carried across the T axis
    t = pl.program_id(1)
    t_blocks = pl.num_programs(1)
    Hp = whh_ref.shape[0]
    TT = gx_ref.shape[0]

    @pl.when(t == 0)
    def _():
        h_ref[...] = jnp.zeros_like(h_ref)
        c_ref[...] = jnp.zeros_like(c_ref)

    # TT recurrence steps per grid step; only the small h @ W_hh matmul is on
    # the serial critical path (input projection was hoisted to the wrapper).
    h = h_ref[...]
    c = c_ref[...]
    for tt in range(TT):  # small static unroll (TT <= 16); carries are just (h, c)
        gates = gx_ref[tt] + jnp.dot(h, whh_ref[...],
                                     preferred_element_type=jnp.float32)
        # Hp is a multiple of 128, so every gate slice is a whole-lane-tile slice.
        i = jax.nn.sigmoid(gates[:, 0 * Hp:1 * Hp])
        f = jax.nn.sigmoid(gates[:, 1 * Hp:2 * Hp])
        g = jnp.tanh(gates[:, 2 * Hp:3 * Hp])
        o = jax.nn.sigmoid(gates[:, 3 * Hp:4 * Hp])
        c = f * c + i * g
        h = o * jnp.tanh(c)
    h_ref[...] = h
    c_ref[...] = c

    @pl.when(t == t_blocks - 1)
    def _():
        # Backward direction at time T-1 == single step from zero state:
        # h0 @ W_hh_b == 0, so only the precomputed input projection matters.
        gb = gb_ref[...]
        i_b = jax.nn.sigmoid(gb[:, 0 * Hp:1 * Hp])
        g_b = jnp.tanh(gb[:, 2 * Hp:3 * Hp])
        o_b = jax.nn.sigmoid(gb[:, 3 * Hp:4 * Hp])
        h_b = o_b * jnp.tanh(i_b * g_b)
        # TODO(synk): Dropout(0.25) is identity in eval mode; training-mode
        # stochastic masking is intentionally not applied here.
        logits = (jnp.dot(h, fcwf_ref[...], preferred_element_type=jnp.float32)
                  + jnp.dot(h_b, fcwb_ref[...], preferred_element_type=jnp.float32)
                  + fcb_ref[...])
        out_ref[...] = jax.nn.sigmoid(logits)


def bilstm_forward(x, params):
    """x: (B, T, D) float32, batch-first.  Returns (B, output_dim) float32."""
    B, T, D = x.shape
    H = params["whh_f"].shape[0]
    O = params["fcw"].shape[1]

    LANE, SUBLANE = 128, 8
    Hp = _round_up(H, LANE)          # lane-aligned gate blocks
    Op = _round_up(O, LANE)          # lane-dense output stores
    Bp = _round_up(B, SUBLANE)       # sublane-aligned batch
    if Bp > LANE:                    # tile the batch so it can be a "parallel" axis
        BB = LANE
        Bp = _round_up(Bp, BB)
    else:
        BB = Bp
    nb = Bp // BB
    TT = _choose_time_tile(T, BB, Hp)  # timesteps per grid step (divides T)

    f32 = jnp.float32
    # ---- pad parameters into the lane/sublane-aligned gate-blocked layout ----
    wih_f = _pad_gates_last(params["wih_f"].astype(f32), H, Hp)           # (D, 4Hp)
    wih_b = _pad_gates_last(params["wih_b"].astype(f32), H, Hp)           # (D, 4Hp)
    b_f = _pad_gates_last(params["b_f"].astype(f32), H, Hp)               # (1, 4Hp)
    b_b = _pad_gates_last(params["b_b"].astype(f32), H, Hp)               # (1, 4Hp)
    whh_f = _pad_gates_last(params["whh_f"].astype(f32), H, Hp)           # (H, 4Hp)
    whh_f = jnp.pad(whh_f, ((0, Hp - H), (0, 0)))                         # (Hp, 4Hp)
    fcw = params["fcw"].astype(f32)                                       # (2H, O)
    fcw_f = jnp.pad(fcw[:H], ((0, Hp - H), (0, Op - O)))                  # (Hp, Op)
    fcw_b = jnp.pad(fcw[H:], ((0, Hp - H), (0, Op - O)))                  # (Hp, Op)
    fcb = jnp.pad(params["fcb"].astype(f32), ((0, 0), (0, Op - O)))       # (1, Op)

    # ---- hoist the input projection out of the recurrence ----
    # One MXU-shaped matmul, emitted directly in (T, B, 4Hp) layout (no extra
    # transpose pass over x).
    gx = jnp.einsum('btd,dg->tbg', x.astype(f32), wih_f) + b_f            # (T, B, 4Hp)
    gx = jnp.pad(gx, ((0, 0), (0, Bp - B), (0, 0)))                       # (T, Bp, 4Hp)
    gb = x[:, -1, :].astype(f32) @ wih_b + b_b                            # (B, 4Hp)
    gb = jnp.pad(gb, ((0, Bp - B), (0, 0)))                               # (Bp, 4Hp)

    # ---- VMEM budget: streamed gx block double-buffered + resident weights ----
    itemsize = 4
    vmem_bytes = itemsize * (
        2 * TT * BB * 4 * Hp      # gx block (double-buffered)
        + 2 * Hp * 4 * Hp         # whh_f
        + 2 * BB * 4 * Hp         # gb
        + 4 * Hp * Op             # fc weights (fwd + bwd halves)
        + 2 * Op                  # fc bias
        + 2 * BB * Op             # output block
        + 2 * BB * Hp)            # h/c scratch
    vmem_limit = min(max(int(vmem_bytes * 2) + (8 << 20), 16 << 20), 48 << 20)

    out = pl.pallas_call(
        bilstm_kernel,
        out_shape=jax.ShapeDtypeStruct((Bp, Op), jnp.float32),
        grid_spec=pltpu.PrefetchScalarGridSpec(
            num_scalar_prefetch=0,
            grid=(nb, T // TT),
            in_specs=[
                pl.BlockSpec((TT, BB, 4 * Hp), lambda b, t: (t, b, 0)),  # gx (streamed)
                pl.BlockSpec((Hp, 4 * Hp), lambda b, t: (0, 0)),         # whh_f
                pl.BlockSpec((BB, 4 * Hp), lambda b, t: (b, 0)),         # gb
                pl.BlockSpec((Hp, Op), lambda b, t: (0, 0)),             # fcw_f
                pl.BlockSpec((Hp, Op), lambda b, t: (0, 0)),             # fcw_b
                pl.BlockSpec((1, Op), lambda b, t: (0, 0)),              # fcb
            ],
            out_specs=pl.BlockSpec((BB, Op), lambda b, t: (b, 0)),
            scratch_shapes=[pltpu.VMEM((BB, Hp), jnp.float32),
                            pltpu.VMEM((BB, Hp), jnp.float32)],
        ),
        compiler_params=pltpu.CompilerParams(
            dimension_semantics=("parallel", "arbitrary"),
            vmem_limit_bytes=vmem_limit),
    )(gx, whh_f, gb, fcw_f, fcw_b, fcb)

    return out[:B, :O]


def init_params(key, input_dim, hidden_dim, output_dim):
    ks = jax.random.split(key, 10)
    scale = 1.0 / jnp.sqrt(hidden_dim)

    def u(k, shape):
        return jax.random.uniform(k, shape, jnp.float32, -scale, scale)

    H = hidden_dim
    return {
        # pre-transposed: (in, 4H) so projections are plain x @ W
        "wih_f": u(ks[0], (input_dim, 4 * H)),
        "whh_f": u(ks[1], (H, 4 * H)),
        "b_f":   u(ks[2], (1, 4 * H)) + u(ks[3], (1, 4 * H)),   # b_ih + b_hh
        "wih_b": u(ks[4], (input_dim, 4 * H)),
        "whh_b": u(ks[5], (H, 4 * H)),
        "b_b":   u(ks[6], (1, 4 * H)) + u(ks[7], (1, 4 * H)),
        "fcw":   u(ks[8], (2 * H, output_dim)),
        "fcb":   u(ks[9], (1, output_dim)),
    }


def _reference(x, p):
    """Pure-JAX reference: full bidirectional LSTM, take t = T-1, fc, sigmoid."""
    B, T, D = x.shape
    H = p["whh_f"].shape[0]

    def step_fn(wih, whh, b):
        def step(carry, x_t):
            h, c = carry
            gates = x_t @ wih + h @ whh + b
            i = jax.nn.sigmoid(gates[:, 0 * H:1 * H])
            f = jax.nn.sigmoid(gates[:, 1 * H:2 * H])
            g = jnp.tanh(gates[:, 2 * H:3 * H])
            o = jax.nn.sigmoid(gates[:, 3 * H:4 * H])
            c = f * c + i * g
            h = o * jnp.tanh(c)
            return (h, c), h
        return step

    h0 = jnp.zeros((B, H), jnp.float32)
    c0 = jnp.zeros((B, H), jnp.float32)
    xt = jnp.transpose(x, (1, 0, 2))  # (T, B, D)

    _, hs_f = lax.scan(step_fn(p["wih_f"], p["whh_f"], p["b_f"]), (h0, c0), xt)
    _, hs_b = lax.scan(step_fn(p["wih_b"], p["whh_b"], p["b_b"]), (h0, c0), xt[::-1])
    hs_b = hs_b[::-1]  # align backward outputs to time index

    last = jnp.concatenate([hs_f[-1], hs_b[-1]], axis=-1)  # (B, 2H)
    return jax.nn.sigmoid(last @ p["fcw"] + p["fcb"])


if __name__ == "__main__":
    B, T, D, H, O = 2, 8, 16, 32, 8

    key = jax.random.PRNGKey(0)
    kx, kp = jax.random.split(key)
    x = jax.random.normal(kx, (B, T, D), jnp.float32)
    params = init_params(kp, D, H, O)

    fwd = jax.jit(bilstm_forward)
    out = jax.block_until_ready(fwd(x, params))
    ref = jax.block_until_ready(_reference(x, params))

    assert out.shape == (B, O)
    assert jnp.allclose(out, ref, atol=2e-5, rtol=1e-5), (out, ref)
    print("KERNEL_OK")
</pallas_src>

<mosaic_0001>
module attributes {stable_mosaic.version = 11 : i64} {
  func.func @bilstm_kernel(%arg0: i32, %arg1: i32, %arg2: memref<8x8x512xf32, #tpu.memory_space<vmem>>, %arg3: memref<128x512xf32, #tpu.memory_space<vmem>>, %arg4: memref<8x512xf32, #tpu.memory_space<vmem>>, %arg5: memref<128x128xf32, #tpu.memory_space<vmem>>, %arg6: memref<128x128xf32, #tpu.memory_space<vmem>>, %arg7: memref<1x128xf32, #tpu.memory_space<vmem>>, %arg8: memref<8x128xf32, #tpu.memory_space<vmem>>, %arg9: memref<8x128xf32, #tpu.memory_space<vmem>>, %arg10: memref<8x128xf32, #tpu.memory_space<vmem>>) attributes {dimension_semantics = [#tpu.dimension_semantics<parallel>, #tpu.dimension_semantics<arbitrary>], iteration_bounds = array<i64: 1, 1>, scalar_prefetch = 0 : i64, scratch_operands = 2 : i64, tpu.core_type = #tpu.core_type<tc>, window_params = [{transform_indices = @transform_0, window_bounds = array<i64: 8, 8, 512>}, {pipeline_mode = #tpu.pipeline_mode<synchronous>, transform_indices = @transform_1, window_bounds = array<i64: 128, 512>}, {transform_indices = @transform_2, window_bounds = array<i64: 8, 512>}, {pipeline_mode = #tpu.pipeline_mode<synchronous>, transform_indices = @transform_3, window_bounds = array<i64: 128, 128>}, {pipeline_mode = #tpu.pipeline_mode<synchronous>, transform_indices = @transform_4, window_bounds = array<i64: 128, 128>}, {pipeline_mode = #tpu.pipeline_mode<synchronous>, transform_indices = @transform_5, window_bounds = array<i64: 1, 128>}, {transform_indices = @transform_6, window_bounds = array<i64: 8, 128>}]} {
    %c0_i32 = arith.constant 0 : i32
    %0 = arith.cmpi eq, %arg1, %c0_i32 : i32
    %1 = arith.extui %0 : i1 to i32
    %c0_i32_0 = arith.constant 0 : i32
    %2 = arith.cmpi ne, %1, %c0_i32_0 : i32
    scf.if %2 {
      %cst_74 = arith.constant 0.000000e+00 : f32
      %250 = vector.broadcast %cst_74 : f32 to vector<8x128xf32>
      %c0_75 = arith.constant 0 : index
      %c0_76 = arith.constant 0 : index
      %251 = vector.load %arg9[%c0_75, %c0_76] : memref<8x128xf32, #tpu.memory_space<vmem>>, vector<8x128xf32>
      tpu.vector_store %arg9[%c0_75, %c0_76], %250 {strides = array<i32>} : memref<8x128xf32, #tpu.memory_space<vmem>>, vector<8x128xf32>,
      %cst_77 = arith.constant 0.000000e+00 : f32
      %252 = vector.broadcast %cst_77 : f32 to vector<8x128xf32>
      %c0_78 = arith.constant 0 : index
      %c0_79 = arith.constant 0 : index
      %253 = vector.load %arg10[%c0_78, %c0_79] : memref<8x128xf32, #tpu.memory_space<vmem>>, vector<8x128xf32>
      tpu.vector_store %arg10[%c0_78, %c0_79], %252 {strides = array<i32>} : memref<8x128xf32, #tpu.memory_space<vmem>>, vector<8x128xf32>,
    } else {
    }
    %c0 = arith.constant 0 : index
    %c0_1 = arith.constant 0 : index
    %3 = vector.load %arg9[%c0, %c0_1] : memref<8x128xf32, #tpu.memory_space<vmem>>, vector<8x128xf32>
    %c0_2 = arith.constant 0 : index
    %c0_3 = arith.constant 0 : index
    %4 = vector.load %arg10[%c0_2, %c0_3] : memref<8x128xf32, #tpu.memory_space<vmem>>, vector<8x128xf32>
    %c0_4 = arith.constant 0 : index
    %c0_5 = arith.constant 0 : index
    %c0_6 = arith.constant 0 : index
    %5 = vector.load %arg2[%c0_4, %c0_5, %c0_6] : memref<8x8x512xf32, #tpu.memory_space<vmem>>, vector<1x8x512xf32>
    %6 = vector.shape_cast %5 : vector<1x8x512xf32> to vector<8x512xf32>
    %c0_7 = arith.constant 0 : index
    %c0_8 = arith.constant 0 : index
    %7 = vector.load %arg3[%c0_7, %c0_8] : memref<128x512xf32, #tpu.memory_space<vmem>>, vector<128x512xf32>
    %cst = arith.constant dense<0.000000e+00> : vector<8x512xf32>
    %8 = tpu.matmul %3, %7, %cst {dimension_numbers = #tpu.dot_dimension_numbers<[1], [0], [0], [1], [0, 0, 1, 1], [], []>} : vector<8x128xf32>, vector<128x512xf32>, vector<8x512xf32> -> vector<8x512xf32>
    %9 = arith.addf %6, %8 : vector<8x512xf32>
    %10 = vector.extract_strided_slice %9 {offsets = [0, 0], sizes = [8, 128], strides = [1, 1]} : vector<8x512xf32> to vector<8x128xf32>
    %11 = arith.negf %10 : vector<8x128xf32>
    %12 = math.exp %11 : vector<8x128xf32>
    %cst_9 = arith.constant 1.000000e+00 : f32
    %13 = vector.broadcast %cst_9 : f32 to vector<8x128xf32>
    %14 = arith.addf %13, %12 : vector<8x128xf32>
    %15 = arith.divf %13, %14 : vector<8x128xf32>
    %16 = vector.extract_strided_slice %9 {offsets = [0, 128], sizes = [8, 128], strides = [1, 1]} : vector<8x512xf32> to vector<8x128xf32>
    %17 = arith.negf %16 : vector<8x128xf32>
    %18 = math.exp %17 : vector<8x128xf32>
    %cst_10 = arith.constant 1.000000e+00 : f32
    %19 = vector.broadcast %cst_10 : f32 to vector<8x128xf32>
    %20 = arith.addf %19, %18 : vector<8x128xf32>
    %21 = arith.divf %19, %20 : vector<8x128xf32>
    %22 = vector.extract_strided_slice %9 {offsets = [0, 256], sizes = [8, 128], strides = [1, 1]} : vector<8x512xf32> to vector<8x128xf32>
    %23 = math.tanh %22 : vector<8x128xf32>
    %24 = vector.extract_strided_slice %9 {offsets = [0, 384], sizes = [8, 128], strides = [1, 1]} : vector<8x512xf32> to vector<8x128xf32>
    %25 = arith.negf %24 : vector<8x128xf32>
    %26 = math.exp %25 : vector<8x128xf32>
    %cst_11 = arith.constant 1.000000e+00 : f32
    %27 = vector.broadcast %cst_11 : f32 to vector<8x128xf32>
    %28 = arith.addf %27, %26 : vector<8x128xf32>
    %29 = arith.divf %27, %28 : vector<8x128xf32>
    %30 = arith.mulf %21, %4 : vector<8x128xf32>
    %31 = arith.mulf %15, %23 : vector<8x128xf32>
    %32 = arith.addf %30, %31 : vector<8x128xf32>
    %33 = math.tanh %32 : vector<8x128xf32>
    %34 = arith.mulf %29, %33 : vector<8x128xf32>
    %c1 = arith.constant 1 : index
    %c0_12 = arith.constant 0 : index
    %c0_13 = arith.constant 0 : index
    %35 = vector.load %arg2[%c1, %c0_12, %c0_13] : memref<8x8x512xf32, #tpu.memory_space<vmem>>, vector<1x8x512xf32>
    %36 = vector.shape_cast %35 : vector<1x8x512xf32> to vector<8x512xf32>
    %c0_14 = arith.constant 0 : index
    %c0_15 = arith.constant 0 : index
    %37 = vector.load %arg3[%c0_14, %c0_15] : memref<128x512xf32, #tpu.memory_space<vmem>>, vector<128x512xf32>
    %cst_16 = arith.constant dense<0.000000e+00> : vector<8x512xf32>
    %38 = tpu.matmul %34, %37, %cst_16 {dimension_numbers = #tpu.dot_dimension_numbers<[1], [0], [0], [1], [0, 0, 1, 1], [], []>} : vector<8x128xf32>, vector<128x512xf32>, vector<8x512xf32> -> vector<8x512xf32>
    %39 = arith.addf %36, %38 : vector<8x512xf32>
    %40 = vector.extract_strided_slice %39 {offsets = [0, 0], sizes = [8, 128], strides = [1, 1]} : vector<8x512xf32> to vector<8x128xf32>
    %41 = arith.negf %40 : vector<8x128xf32>
    %42 = math.exp %41 : vector<8x128xf32>
    %cst_17 = arith.constant 1.000000e+00 : f32
    %43 = vector.broadcast %cst_17 : f32 to vector<8x128xf32>
    %44 = arith.addf %43, %42 : vector<8x128xf32>
    %45 = arith.divf %43, %44 : vector<8x128xf32>
    %46 = vector.extract_strided_slice %39 {offsets = [0, 128], sizes = [8, 128], strides = [1, 1]} : vector<8x512xf32> to vector<8x128xf32>
    %47 = arith.negf %46 : vector<8x128xf32>
    %48 = math.exp %47 : vector<8x128xf32>
    %cst_18 = arith.constant 1.000000e+00 : f32
    %49 = vector.broadcast %cst_18 : f32 to vector<8x128xf32>
    %50 = arith.addf %49, %48 : vector<8x128xf32>
    %51 = arith.divf %49, %50 : vector<8x128xf32>
    %52 = vector.extract_strided_slice %39 {offsets = [0, 256], sizes = [8, 128], strides = [1, 1]} : vector<8x512xf32> to vector<8x128xf32>
    %53 = math.tanh %52 : vector<8x128xf32>
    %54 = vector.extract_strided_slice %39 {offsets = [0, 384], sizes = [8, 128], strides = [1, 1]} : vector<8x512xf32> to vector<8x128xf32>
    %55 = arith.negf %54 : vector<8x128xf32>
    %56 = math.exp %55 : vector<8x128xf32>
    %cst_19 = arith.constant 1.000000e+00 : f32
    %57 = vector.broadcast %cst_19 : f32 to vector<8x128xf32>
    %58 = arith.addf %57, %56 : vector<8x128xf32>
    %59 = arith.divf %57, %58 : vector<8x128xf32>
    %60 = arith.mulf %51, %32 : vector<8x128xf32>
    %61 = arith.mulf %45, %53 : vector<8x128xf32>
    %62 = arith.addf %60, %61 : vector<8x128xf32>
    %63 = math.tanh %62 : vector<8x128xf32>
    %64 = arith.mulf %59, %63 : vector<8x128xf32>
    %c2 = arith.constant 2 : index
    %c0_20 = arith.constant 0 : index
    %c0_21 = arith.constant 0 : index
    %65 = vector.load %arg2[%c2, %c0_20, %c0_21] : memref<8x8x512xf32, #tpu.memory_space<vmem>>, vector<1x8x512xf32>
    %66 = vector.shape_cast %65 : vector<1x8x512xf32> to vector<8x512xf32>
    %c0_22 = arith.constant 0 : index
    %c0_23 = arith.constant 0 : index
    %67 = vector.load %arg3[%c0_22, %c0_23] : memref<128x512xf32, #tpu.memory_space<vmem>>, vector<128x512xf32>
    %cst_24 = arith.constant dense<0.000000e+00> : vector<8x512xf32>
    %68 = tpu.matmul %64, %67, %cst_24 {dimension_numbers = #tpu.dot_dimension_numbers<[1], [0], [0], [1], [0, 0, 1, 1], [], []>} : vector<8x128xf32>, vector<128x512xf32>, vector<8x512xf32> -> vector<8x512xf32>
    %69 = arith.addf %66, %68 : vector<8x512xf32>
    %70 = vector.extract_strided_slice %69 {offsets = [0, 0], sizes = [8, 128], strides = [1, 1]} : vector<8x512xf32> to vector<8x128xf32>
    %71 = arith.negf %70 : vector<8x128xf32>
    %72 = math.exp %71 : vector<8x128xf32>
    %cst_25 = arith.constant 1.000000e+00 : f32
    %73 = vector.broadcast %cst_25 : f32 to vector<8x128xf32>
    %74 = arith.addf %73, %72 : vector<8x128xf32>
    %75 = arith.divf %73, %74 : vector<8x128xf32>
    %76 = vector.extract_strided_slice %69 {offsets = [0, 128], sizes = [8, 128], strides = [1, 1]} : vector<8x512xf32> to vector<8x128xf32>
    %77 = arith.negf %76 : vector<8x128xf32>
    %78 = math.exp %77 : vector<8x128xf32>
    %cst_26 = arith.constant 1.000000e+00 : f32
    %79 = vector.broadcast %cst_26 : f32 to vector<8x128xf32>
    %80 = arith.addf %79, %78 : vector<8x128xf32>
    %81 = arith.divf %79, %80 : vector<8x128xf32>
    %82 = vector.extract_strided_slice %69 {offsets = [0, 256], sizes = [8, 128], strides = [1, 1]} : vector<8x512xf32> to vector<8x128xf32>
    %83 = math.tanh %82 : vector<8x128xf32>
    %84 = vector.extract_strided_slice %69 {offsets = [0, 384], sizes = [8, 128], strides = [1, 1]} : vector<8x512xf32> to vector<8x128xf32>
    %85 = arith.negf %84 : vector<8x128xf32>
    %86 = math.exp %85 : vector<8x128xf32>
    %cst_27 = arith.constant 1.000000e+00 : f32
    %87 = vector.broadcast %cst_27 : f32 to vector<8x128xf32>
    %88 = arith.addf %87, %86 : vector<8x128xf32>
    %89 = arith.divf %87, %88 : vector<8x128xf32>
    %90 = arith.mulf %81, %62 : vector<8x128xf32>
    %91 = arith.mulf %75, %83 : vector<8x128xf32>
    %92 = arith.addf %90, %91 : vector<8x128xf32>
    %93 = math.tanh %92 : vector<8x128xf32>
    %94 = arith.mulf %89, %93 : vector<8x128xf32>
    %c3 = arith.constant 3 : index
    %c0_28 = arith.constant 0 : index
    %c0_29 = arith.constant 0 : index
    %95 = vector.load %arg2[%c3, %c0_28, %c0_29] : memref<8x8x512xf32, #tpu.memory_space<vmem>>, vector<1x8x512xf32>
    %96 = vector.shape_cast %95 : vector<1x8x512xf32> to vector<8x512xf32>
    %c0_30 = arith.constant 0 : index
    %c0_31 = arith.constant 0 : index
    %97 = vector.load %arg3[%c0_30, %c0_31] : memref<128x512xf32, #tpu.memory_space<vmem>>, vector<128x512xf32>
    %cst_32 = arith.constant dense<0.000000e+00> : vector<8x512xf32>
    %98 = tpu.matmul %94, %97, %cst_32 {dimension_numbers = #tpu.dot_dimension_numbers<[1], [0], [0], [1], [0, 0, 1, 1], [], []>} : vector<8x128xf32>, vector<128x512xf32>, vector<8x512xf32> -> vector<8x512xf32>
    %99 = arith.addf %96, %98 : vector<8x512xf32>
    %100 = vector.extract_strided_slice %99 {offsets = [0, 0], sizes = [8, 128], strides = [1, 1]} : vector<8x512xf32> to vector<8x128xf32>
    %101 = arith.negf %100 : vector<8x128xf32>
    %102 = math.exp %101 : vector<8x128xf32>
    %cst_33 = arith.constant 1.000000e+00 : f32
    %103 = vector.broadcast %cst_33 : f32 to vector<8x128xf32>
    %104 = arith.addf %103, %102 : vector<8x128xf32>
    %105 = arith.divf %103, %104 : vector<8x128xf32>
    %106 = vector.extract_strided_slice %99 {offsets = [0, 128], sizes = [8, 128], strides = [1, 1]} : vector<8x512xf32> to vector<8x128xf32>
    %107 = arith.negf %106 : vector<8x128xf32>
    %108 = math.exp %107 : vector<8x128xf32>
    %cst_34 = arith.constant 1.000000e+00 : f32
    %109 = vector.broadcast %cst_34 : f32 to vector<8x128xf32>
    %110 = arith.addf %109, %108 : vector<8x128xf32>
    %111 = arith.divf %109, %110 : vector<8x128xf32>
    %112 = vector.extract_strided_slice %99 {offsets = [0, 256], sizes = [8, 128], strides = [1, 1]} : vector<8x512xf32> to vector<8x128xf32>
    %113 = math.tanh %112 : vector<8x128xf32>
    %114 = vector.extract_strided_slice %99 {offsets = [0, 384], sizes = [8, 128], strides = [1, 1]} : vector<8x512xf32> to vector<8x128xf32>
    %115 = arith.negf %114 : vector<8x128xf32>
    %116 = math.exp %115 : vector<8x128xf32>
    %cst_35 = arith.constant 1.000000e+00 : f32
    %117 = vector.broadcast %cst_35 : f32 to vector<8x128xf32>
    %118 = arith.addf %117, %116 : vector<8x128xf32>
    %119 = arith.divf %117, %118 : vector<8x128xf32>
    %120 = arith.mulf %111, %92 : vector<8x128xf32>
    %121 = arith.mulf %105, %113 : vector<8x128xf32>
    %122 = arith.addf %120, %121 : vector<8x128xf32>
    %123 = math.tanh %122 : vector<8x128xf32>
    %124 = arith.mulf %119, %123 : vector<8x128xf32>
    %c4 = arith.constant 4 : index
    %c0_36 = arith.constant 0 : index
    %c0_37 = arith.constant 0 : index
    %125 = vector.load %arg2[%c4, %c0_36, %c0_37] : memref<8x8x512xf32, #tpu.memory_space<vmem>>, vector<1x8x512xf32>
    %126 = vector.shape_cast %125 : vector<1x8x512xf32> to vector<8x512xf32>
    %c0_38 = arith.constant 0 : index
    %c0_39 = arith.constant 0 : index
    %127 = vector.load %arg3[%c0_38, %c0_39] : memref<128x512xf32, #tpu.memory_space<vmem>>, vector<128x512xf32>
    %cst_40 = arith.constant dense<0.000000e+00> : vector<8x512xf32>
    %128 = tpu.matmul %124, %127, %cst_40 {dimension_numbers = #tpu.dot_dimension_numbers<[1], [0], [0], [1], [0, 0, 1, 1], [], []>} : vector<8x128xf32>, vector<128x512xf32>, vector<8x512xf32> -> vector<8x512xf32>
    %129 = arith.addf %126, %128 : vector<8x512xf32>
    %130 = vector.extract_strided_slice %129 {offsets = [0, 0], sizes = [8, 128], strides = [1, 1]} : vector<8x512xf32> to vector<8x128xf32>
    %131 = arith.negf %130 : vector<8x128xf32>
    %132 = math.exp %131 : vector<8x128xf32>
    %cst_41 = arith.constant 1.000000e+00 : f32
    %133 = vector.broadcast %cst_41 : f32 to vector<8x128xf32>
    %134 = arith.addf %133, %132 : vector<8x128xf32>
    %135 = arith.divf %133, %134 : vector<8x128xf32>
    %136 = vector.extract_strided_slice %129 {offsets = [0, 128], sizes = [8, 128], strides = [1, 1]} : vector<8x512xf32> to vector<8x128xf32>
    %137 = arith.negf %136 : vector<8x128xf32>
    %138 = math.exp %137 : vector<8x128xf32>
    %cst_42 = arith.constant 1.000000e+00 : f32
    %139 = vector.broadcast %cst_42 : f32 to vector<8x128xf32>
    %140 = arith.addf %139, %138 : vector<8x128xf32>
    %141 = arith.divf %139, %140 : vector<8x128xf32>
    %142 = vector.extract_strided_slice %129 {offsets = [0, 256], sizes = [8, 128], strides = [1, 1]} : vector<8x512xf32> to vector<8x128xf32>
    %143 = math.tanh %142 : vector<8x128xf32>
    %144 = vector.extract_strided_slice %129 {offsets = [0, 384], sizes = [8, 128], strides = [1, 1]} : vector<8x512xf32> to vector<8x128xf32>
    %145 = arith.negf %144 : vector<8x128xf32>
    %146 = math.exp %145 : vector<8x128xf32>
    %cst_43 = arith.constant 1.000000e+00 : f32
    %147 = vector.broadcast %cst_43 : f32 to vector<8x128xf32>
    %148 = arith.addf %147, %146 : vector<8x128xf32>
    %149 = arith.divf %147, %148 : vector<8x128xf32>
    %150 = arith.mulf %141, %122 : vector<8x128xf32>
    %151 = arith.mulf %135, %143 : vector<8x128xf32>
    %152 = arith.addf %150, %151 : vector<8x128xf32>
    %153 = math.tanh %152 : vector<8x128xf32>
    %154 = arith.mulf %149, %153 : vector<8x128xf32>
    %c5 = arith.constant 5 : index
    %c0_44 = arith.constant 0 : index
    %c0_45 = arith.constant 0 : index
    %155 = vector.load %arg2[%c5, %c0_44, %c0_45] : memref<8x8x512xf32, #tpu.memory_space<vmem>>, vector<1x8x512xf32>
    %156 = vector.shape_cast %155 : vector<1x8x512xf32> to vector<8x512xf32>
    %c0_46 = arith.constant 0 : index
    %c0_47 = arith.constant 0 : index
    %157 = vector.load %arg3[%c0_46, %c0_47] : memref<128x512xf32, #tpu.memory_space<vmem>>, vector<128x512xf32>
    %cst_48 = arith.constant dense<0.000000e+00> : vector<8x512xf32>
    %158 = tpu.matmul %154, %157, %cst_48 {dimension_numbers = #tpu.dot_dimension_numbers<[1], [0], [0], [1], [0, 0, 1, 1], [], []>} : vector<8x128xf32>, vector<128x512xf32>, vector<8x512xf32> -> vector<8x512xf32>
    %159 = arith.addf %156, %158 : vector<8x512xf32>
    %160 = vector.extract_strided_slice %159 {offsets = [0, 0], sizes = [8, 128], strides = [1, 1]} : vector<8x512xf32> to vector<8x128xf32>
    %161 = arith.negf %160 : vector<8x128xf32>
    %162 = math.exp %161 : vector<8x128xf32>
    %cst_49 = arith.constant 1.000000e+00 : f32
    %163 = vector.broadcast %cst_49 : f32 to vector<8x128xf32>
    %164 = arith.addf %163, %162 : vector<8x128xf32>
    %165 = arith.divf %163, %164 : vector<8x128xf32>
    %166 = vector.extract_strided_slice %159 {offsets = [0, 128], sizes = [8, 128], strides = [1, 1]} : vector<8x512xf32> to vector<8x128xf32>
    %167 = arith.negf %166 : vector<8x128xf32>
    %168 = math.exp %167 : vector<8x128xf32>
    %cst_50 = arith.constant 1.000000e+00 : f32
    %169 = vector.broadcast %cst_50 : f32 to vector<8x128xf32>
    %170 = arith.addf %169, %168 : vector<8x128xf32>
    %171 = arith.divf %169, %170 : vector<8x128xf32>
    %172 = vector.extract_strided_slice %159 {offsets = [0, 256], sizes = [8, 128], strides = [1, 1]} : vector<8x512xf32> to vector<8x128xf32>
    %173 = math.tanh %172 : vector<8x128xf32>
    %174 = vector.extract_strided_slice %159 {offsets = [0, 384], sizes = [8, 128], strides = [1, 1]} : vector<8x512xf32> to vector<8x128xf32>
    %175 = arith.negf %174 : vector<8x128xf32>
    %176 = math.exp %175 : vector<8x128xf32>
    %cst_51 = arith.constant 1.000000e+00 : f32
    %177 = vector.broadcast %cst_51 : f32 to vector<8x128xf32>
    %178 = arith.addf %177, %176 : vector<8x128xf32>
    %179 = arith.divf %177, %178 : vector<8x128xf32>
    %180 = arith.mulf %171, %152 : vector<8x128xf32>
    %181 = arith.mulf %165, %173 : vector<8x128xf32>
    %182 = arith.addf %180, %181 : vector<8x128xf32>
    %183 = math.tanh %182 : vector<8x128xf32>
    %184 = arith.mulf %179, %183 : vector<8x128xf32>
    %c6 = arith.constant 6 : index
    %c0_52 = arith.constant 0 : index
    %c0_53 = arith.constant 0 : index
    %185 = vector.load %arg2[%c6, %c0_52, %c0_53] : memref<8x8x512xf32, #tpu.memory_space<vmem>>, vector<1x8x512xf32>
    %186 = vector.shape_cast %185 : vector<1x8x512xf32> to vector<8x512xf32>
    %c0_54 = arith.constant 0 : index
    %c0_55 = arith.constant 0 : index
    %187 = vector.load %arg3[%c0_54, %c0_55] : memref<128x512xf32, #tpu.memory_space<vmem>>, vector<128x512xf32>
    %cst_56 = arith.constant dense<0.000000e+00> : vector<8x512xf32>
    %188 = tpu.matmul %184, %187, %cst_56 {dimension_numbers = #tpu.dot_dimension_numbers<[1], [0], [0], [1], [0, 0, 1, 1], [], []>} : vector<8x128xf32>, vector<128x512xf32>, vector<8x512xf32> -> vector<8x512xf32>
    %189 = arith.addf %186, %188 : vector<8x512xf32>
    %190 = vector.extract_strided_slice %189 {offsets = [0, 0], sizes = [8, 128], strides = [1, 1]} : vector<8x512xf32> to vector<8x128xf32>
    %191 = arith.negf %190 : vector<8x128xf32>
    %192 = math.exp %191 : vector<8x128xf32>
    %cst_57 = arith.constant 1.000000e+00 : f32
    %193 = vector.broadcast %cst_57 : f32 to vector<8x128xf32>
    %194 = arith.addf %193, %192 : vector<8x128xf32>
    %195 = arith.divf %193, %194 : vector<8x128xf32>
    %196 = vector.extract_strided_slice %189 {offsets = [0, 128], sizes = [8, 128], strides = [1, 1]} : vector<8x512xf32> to vector<8x128xf32>
    %197 = arith.negf %196 : vector<8x128xf32>
    %198 = math.exp %197 : vector<8x128xf32>
    %cst_58 = arith.constant 1.000000e+00 : f32
    %199 = vector.broadcast %cst_58 : f32 to vector<8x128xf32>
    %200 = arith.addf %199, %198 : vector<8x128xf32>
    %201 = arith.divf %199, %200 : vector<8x128xf32>
    %202 = vector.extract_strided_slice %189 {offsets = [0, 256], sizes = [8, 128], strides = [1, 1]} : vector<8x512xf32> to vector<8x128xf32>
    %203 = math.tanh %202 : vector<8x128xf32>
    %204 = vector.extract_strided_slice %189 {offsets = [0, 384], sizes = [8, 128], strides = [1, 1]} : vector<8x512xf32> to vector<8x128xf32>
    %205 = arith.negf %204 : vector<8x128xf32>
    %206 = math.exp %205 : vector<8x128xf32>
    %cst_59 = arith.constant 1.000000e+00 : f32
    %207 = vector.broadcast %cst_59 : f32 to vector<8x128xf32>
    %208 = arith.addf %207, %206 : vector<8x128xf32>
    %209 = arith.divf %207, %208 : vector<8x128xf32>
    %210 = arith.mulf %201, %182 : vector<8x128xf32>
    %211 = arith.mulf %195, %203 : vector<8x128xf32>
    %212 = arith.addf %210, %211 : vector<8x128xf32>
    %213 = math.tanh %212 : vector<8x128xf32>
    %214 = arith.mulf %209, %213 : vector<8x128xf32>
    %c7 = arith.constant 7 : index
    %c0_60 = arith.constant 0 : index
    %c0_61 = arith.constant 0 : index
    %215 = vector.load %arg2[%c7, %c0_60, %c0_61] : memref<8x8x512xf32, #tpu.memory_space<vmem>>, vector<1x8x512xf32>
    %216 = vector.shape_cast %215 : vector<1x8x512xf32> to vector<8x512xf32>
    %c0_62 = arith.constant 0 : index
    %c0_63 = arith.constant 0 : index
    %217 = vector.load %arg3[%c0_62, %c0_63] : memref<128x512xf32, #tpu.memory_space<vmem>>, vector<128x512xf32>
    %cst_64 = arith.constant dense<0.000000e+00> : vector<8x512xf32>
    %218 = tpu.matmul %214, %217, %cst_64 {dimension_numbers = #tpu.dot_dimension_numbers<[1], [0], [0], [1], [0, 0, 1, 1], [], []>} : vector<8x128xf32>, vector<128x512xf32>, vector<8x512xf32> -> vector<8x512xf32>
    %219 = arith.addf %216, %218 : vector<8x512xf32>
    %220 = vector.extract_strided_slice %219 {offsets = [0, 0], sizes = [8, 128], strides = [1, 1]} : vector<8x512xf32> to vector<8x128xf32>
    %221 = arith.negf %220 : vector<8x128xf32>
    %222 = math.exp %221 : vector<8x128xf32>
    %cst_65 = arith.constant 1.000000e+00 : f32
    %223 = vector.broadcast %cst_65 : f32 to vector<8x128xf32>
    %224 = arith.addf %223, %222 : vector<8x128xf32>
    %225 = arith.divf %223, %224 : vector<8x128xf32>
    %226 = vector.extract_strided_slice %219 {offsets = [0, 128], sizes = [8, 128], strides = [1, 1]} : vector<8x512xf32> to vector<8x128xf32>
    %227 = arith.negf %226 : vector<8x128xf32>
    %228 = math.exp %227 : vector<8x128xf32>
    %cst_66 = arith.constant 1.000000e+00 : f32
    %229 = vector.broadcast %cst_66 : f32 to vector<8x128xf32>
    %230 = arith.addf %229, %228 : vector<8x128xf32>
    %231 = arith.divf %229, %230 : vector<8x128xf32>
    %232 = vector.extract_strided_slice %219 {offsets = [0, 256], sizes = [8, 128], strides = [1, 1]} : vector<8x512xf32> to vector<8x128xf32>
    %233 = math.tanh %232 : vector<8x128xf32>
    %234 = vector.extract_strided_slice %219 {offsets = [0, 384], sizes = [8, 128], strides = [1, 1]} : vector<8x512xf32> to vector<8x128xf32>
    %235 = arith.negf %234 : vector<8x128xf32>
    %236 = math.exp %235 : vector<8x128xf32>
    %cst_67 = arith.constant 1.000000e+00 : f32
    %237 = vector.broadcast %cst_67 : f32 to vector<8x128xf32>
    %238 = arith.addf %237, %236 : vector<8x128xf32>
    %239 = arith.divf %237, %238 : vector<8x128xf32>
    %240 = arith.mulf %231, %212 : vector<8x128xf32>
    %241 = arith.mulf %225, %233 : vector<8x128xf32>
    %242 = arith.addf %240, %241 : vector<8x128xf32>
    %243 = math.tanh %242 : vector<8x128xf32>
    %244 = arith.mulf %239, %243 : vector<8x128xf32>
    %c0_68 = arith.constant 0 : index
    %c0_69 = arith.constant 0 : index
    %245 = vector.load %arg9[%c0_68, %c0_69] : memref<8x128xf32, #tpu.memory_space<vmem>>, vector<8x128xf32>
    tpu.vector_store %arg9[%c0_68, %c0_69], %244 {strides = array<i32>} : memref<8x128xf32, #tpu.memory_space<vmem>>, vector<8x128xf32>,
    %c0_70 = arith.constant 0 : index
    %c0_71 = arith.constant 0 : index
    %246 = vector.load %arg10[%c0_70, %c0_71] : memref<8x128xf32, #tpu.memory_space<vmem>>, vector<8x128xf32>
    tpu.vector_store %arg10[%c0_70, %c0_71], %242 {strides = array<i32>} : memref<8x128xf32, #tpu.memory_space<vmem>>, vector<8x128xf32>,
    %c0_i32_72 = arith.constant 0 : i32
    %247 = arith.cmpi eq, %arg1, %c0_i32_72 : i32
    %248 = arith.extui %247 : i1 to i32
    %c0_i32_73 = arith.constant 0 : i32
    %249 = arith.cmpi ne, %248, %c0_i32_73 : i32
    scf.if %249 {
      %c0_74 = arith.constant 0 : index
      %c0_75 = arith.constant 0 : index
      %250 = vector.load %arg4[%c0_74, %c0_75] : memref<8x512xf32, #tpu.memory_space<vmem>>, vector<8x512xf32>
      %251 = vector.extract_strided_slice %250 {offsets = [0, 0], sizes = [8, 128], strides = [1, 1]} : vector<8x512xf32> to vector<8x128xf32>
      %252 = arith.negf %251 : vector<8x128xf32>
      %253 = math.exp %252 : vector<8x128xf32>
      %cst_76 = arith.constant 1.000000e+00 : f32
      %254 = vector.broadcast %cst_76 : f32 to vector<8x128xf32>
      %255 = arith.addf %254, %253 : vector<8x128xf32>
      %256 = arith.divf %254, %255 : vector<8x128xf32>
      %257 = vector.extract_strided_slice %250 {offsets = [0, 256], sizes = [8, 128], strides = [1, 1]} : vector<8x512xf32> to vector<8x128xf32>
      %258 = math.tanh %257 : vector<8x128xf32>
      %259 = vector.extract_strided_slice %250 {offsets = [0, 384], sizes = [8, 128], strides = [1, 1]} : vector<8x512xf32> to vector<8x128xf32>
      %260 = arith.negf %259 : vector<8x128xf32>
      %261 = math.exp %260 : vector<8x128xf32>
      %cst_77 = arith.constant 1.000000e+00 : f32
      %262 = vector.broadcast %cst_77 : f32 to vector<8x128xf32>
      %263 = arith.addf %262, %261 : vector<8x128xf32>
      %264 = arith.divf %262, %263 : vector<8x128xf32>
      %265 = arith.mulf %256, %258 : vector<8x128xf32>
      %266 = math.tanh %265 : vector<8x128xf32>
      %267 = arith.mulf %264, %266 : vector<8x128xf32>
      %c0_78 = arith.constant 0 : index
      %c0_79 = arith.constant 0 : index
      %268 = vector.load %arg5[%c0_78, %c0_79] : memref<128x128xf32, #tpu.memory_space<vmem>>, vector<128x128xf32>
      %cst_80 = arith.constant dense<0.000000e+00> : vector<8x128xf32>
      %269 = tpu.matmul %244, %268, %cst_80 {dimension_numbers = #tpu.dot_dimension_numbers<[1], [0], [0], [1], [0, 0, 1, 1], [], []>} : vector<8x128xf32>, vector<128x128xf32>, vector<8x128xf32> -> vector<8x128xf32>
      %c0_81 = arith.constant 0 : index
      %c0_82 = arith.constant 0 : index
      %270 = vector.load %arg6[%c0_81, %c0_82] : memref<128x128xf32, #tpu.memory_space<vmem>>, vector<128x128xf32>
      %cst_83 = arith.constant dense<0.000000e+00> : vector<8x128xf32>
      %271 = tpu.matmul %267, %270, %cst_83 {dimension_numbers = #tpu.dot_dimension_numbers<[1], [0], [0], [1], [0, 0, 1, 1], [], []>} : vector<8x128xf32>, vector<128x128xf32>, vector<8x128xf32> -> vector<8x128xf32>
      %272 = arith.addf %269, %271 : vector<8x128xf32>
      %c0_84 = arith.constant 0 : index
      %c0_85 = arith.constant 0 : index
      %273 = vector.load %arg7[%c0_84, %c0_85] : memref<1x128xf32, #tpu.memory_space<vmem>>, vector<1x128xf32>
      %274 = vector.broadcast %273 : vector<1x128xf32> to vector<8x128xf32>
      %275 = arith.addf %272, %274 : vector<8x128xf32>
      %276 = arith.negf %275 : vector<8x128xf32>
      %277 = math.exp %276 : vector<8x128xf32>
      %cst_86 = arith.constant 1.000000e+00 : f32
      %278 = vector.broadcast %cst_86 : f32 to vector<8x128xf32>
      %279 = arith.addf %278, %277 : vector<8x128xf32>
      %280 = arith.divf %278, %279 : vector<8x128xf32>
      %c0_87 = arith.constant 0 : index
      %c0_88 = arith.constant 0 : index
      %281 = vector.load %arg8[%c0_87, %c0_88] : memref<8x128xf32, #tpu.memory_space<vmem>>, vector<8x128xf32>
      tpu.vector_store %arg8[%c0_87, %c0_88], %280 {strides = array<i32>} : memref<8x128xf32, #tpu.memory_space<vmem>>, vector<8x128xf32>,
    } else {
    }
    return
  }
  func.func @transform_0(%arg0: i32, %arg1: i32) -> (i32, i32, i32) {
    %c0_i32 = arith.constant 0 : i32
    %c0_i32_0 = arith.constant 0 : i32
    return %arg1, %arg0, %c0_i32 : i32, i32, i32
  }
  func.func @transform_1(%arg0: i32, %arg1: i32) -> (i32, i32) {
    %c0_i32 = arith.constant 0 : i32
    %c0_i32_0 = arith.constant 0 : i32
    %c0_i32_1 = arith.constant 0 : i32
    return %c0_i32, %c0_i32_0 : i32, i32
  }
  func.func @transform_2(%arg0: i32, %arg1: i32) -> (i32, i32) {
    %c0_i32 = arith.constant 0 : i32
    %c0_i32_0 = arith.constant 0 : i32
    return %arg0, %c0_i32 : i32, i32
  }
  func.func @transform_3(%arg0: i32, %arg1: i32) -> (i32, i32) {
    %c0_i32 = arith.constant 0 : i32
    %c0_i32_0 = arith.constant 0 : i32
    %c0_i32_1 = arith.constant 0 : i32
    return %c0_i32, %c0_i32_0 : i32, i32
  }
  func.func @transform_4(%arg0: i32, %arg1: i32) -> (i32, i32) {
    %c0_i32 = arith.constant 0 : i32
    %c0_i32_0 = arith.constant 0 : i32
    %c0_i32_1 = arith.constant 0 : i32
    return %c0_i32, %c0_i32_0 : i32, i32
  }
  func.func @transform_5(%arg0: i32, %arg1: i32) -> (i32, i32) {
    %c0_i32 = arith.constant 0 : i32
    %c0_i32_0 = arith.constant 0 : i32
    %c0_i32_1 = arith.constant 0 : i32
    return %c0_i32, %c0_i32_0 : i32, i32
  }
  func.func @transform_6(%arg0: i32, %arg1: i32) -> (i32, i32) {
    %c0_i32 = arith.constant 0 : i32
    %c0_i32_0 = arith.constant 0 : i32
    return %arg0, %c0_i32 : i32, i32
  }
}

</mosaic_0001>

<bundles_post_ra>
// kernel: bilstm_forward.1
= control target key start
LH: loop header
LB: loop body
LE: loop exit
PB: predicated region body
PF: predicated region fallthrough
CT: control target
= control target key end

     0   :  { %v3564_v3 = vmov 0.0   ;;  %vm2080_vm0 = vmmov 0   ;;  %s3555_s1 = inlined_call_operand.vmem [shape: f32[128,512], index: 1, kind: input, shape index: {}]   ;;  %s3556_s0 = inlined_call_operand.vmem [shape: f32[8,8,512], index: 0, kind: input, shape index: {}]   ;;  %s3557_s2 = inlined_call_operand.vmem [shape: f32[8,512], index: 2, kind: input, shape index: {}]   ;;  %s3558_s4 = inlined_call_operand.vmem [shape: f32[128,128], index: 4, kind: input, shape index: {}]   ;;  %s3559_s3 = inlined_call_operand.vmem [shape: f32[128,128], index: 3, kind: input, shape index: {}]   ;;  %s3560_s5 = inlined_call_operand.vmem [shape: f32[1,128], index: 5, kind: input, shape index: {}]   ;;  %s3561_s6 = inlined_call_operand.vmem [shape: f32[8,128], index: 6, kind: output, shape index: {}]  }
   0x1   :  { %v2119_v0 = vld [vmem:[%s3555_s1 + $0x1e8] sm:$0xff]  ;;  %v2124_v1 = vld [vmem:[%s3555_s1 + $0x1e0] sm:$0xff]  ;;  %163 = vmatprep.mubr.f32.mxu0 %v3564_v3  ;;  %234 = vmatprep.mubr.f32.mxu1 %v3564_v3  ;;  %v2166_v9 = vld [vmem:[%s3555_s1 + $0x1f8] sm:$0xff] }
   0x2   :  { %3626 = vst [vmem:[#allocation4_spill] sm:$0xff] %v2119_v0  ;;  %v2129_v2 = vld [vmem:[%s3555_s1 + $0x1c8] sm:$0xff]  ;;  %99 = vmatprep.subr.mxu0 %v2119_v0  ;;  %v2137_v4 = vld [vmem:[%s3555_s1 + $0x1c0] sm:$0xff]  ;;  %3627 = vst [vmem:[#allocation5_spill] sm:$0xff] %v2166_v9  ;;  %170 = vmatprep.subr.mxu1 %v2166_v9 }
   0x3   :  { %100 = vmatpush1.msra.mxu0 %v2124_v1  ;;  %v2143_v5 = vld [vmem:[%s3555_s1 + $0x1a8] sm:$0xff]  ;;  %v2149_v6 = vld [vmem:[%s3555_s1 + $0x1a0] sm:$0xff]  ;;  %v2178_v11 = vld [vmem:[%s3555_s1 + $0x1f0] sm:$0xff] }
   0x4   :  { %101 = vmatprep.subr.mxu0 %v2129_v2  ;;  %v2155_v7 = vld [vmem:[%s3555_s1 + $0x188] sm:$0xff]  ;;  %v2161_v8 = vld [vmem:[%s3555_s1 + $0x180] sm:$0xff]  ;;  %171 = vmatpush1.msra.mxu1 %v2178_v11  ;;  %v2190_v13 = vld [vmem:[%s3555_s1 + $0x1d8] sm:$0xff] }
   0x5   :  { %102 = vmatpush1.msra.mxu0 %v2137_v4  ;;  %v2172_v10 = vld [vmem:[%s3555_s1 + $0x168] sm:$0xff]  ;;  %v2184_v12 = vld [vmem:[%s3555_s1 + $0x160] sm:$0xff]  ;;  %v2195_v14 = vld [vmem:[%s3555_s1 + $0x1d0] sm:$0xff]  ;;  %172 = vmatprep.subr.mxu1 %v2190_v13 }
   0x6   :  { %103 = vmatprep.subr.mxu0 %v2143_v5  ;;  %v2201_v15 = vld [vmem:[%s3555_s1 + $0x148] sm:$0xff]  ;;  %v2207_v16 = vld [vmem:[%s3555_s1 + $0x1b8] sm:$0xff]  ;;  %v2213_v17 = vld [vmem:[%s3555_s1 + $0x140] sm:$0xff]  ;;  %173 = vmatpush1.msra.mxu1 %v2195_v14 }
   0x7   :  { %104 = vmatpush1.msra.mxu0 %v2149_v6  ;;  %v2219_v18 = vld [vmem:[%s3555_s1 + $0x1b0] sm:$0xff]  ;;  %v2224_v19 = vld [vmem:[%s3555_s1 + $0x198] sm:$0xff]  ;;  %v2230_v20 = vld [vmem:[%s3555_s1 + $0x128] sm:$0xff]  ;;  %174 = vmatprep.subr.mxu1 %v2207_v16 }
   0x8   :  { %105 = vmatprep.subr.mxu0 %v2155_v7  ;;  %v2236_v21 = vld [vmem:[%s3555_s1 + $0x190] sm:$0xff]  ;;  %v2242_v22 = vld [vmem:[%s3555_s1 + $0x120] sm:$0xff]  ;;  %175 = vmatpush1.msra.mxu1 %v2219_v18  ;;  %v2248_v23 = vld [vmem:[%s3555_s1 + $0x178] sm:$0xff] }
   0x9   :  { %106 = vmatpush1.msra.mxu0 %v2161_v8  ;;  %v2254_v24 = vld [vmem:[%s3555_s1 + $0x108] sm:$0xff]  ;;  %176 = vmatprep.subr.mxu1 %v2224_v19  ;;  %v2260_v25 = vld [vmem:[%s3555_s1 + $0x170] sm:$0xff]  ;;  %v2266_v26 = vld [vmem:[%s3555_s1 + $0x100] sm:$0xff] }
   0xa   :  { %107 = vmatprep.subr.mxu0 %v2172_v10  ;;  %177 = vmatpush1.msra.mxu1 %v2236_v21  ;;  %v2272_v27 = vld [vmem:[%s3555_s1 + $0x158] sm:$0xff]  ;;  %v2278_v28 = vld [vmem:[%s3555_s1 + $0xe8] sm:$0xff]  ;;  %v2284_v29 = vld [vmem:[%s3555_s1 + $0x150] sm:$0xff] }
   0xb   :  { %108 = vmatpush1.msra.mxu0 %v2184_v12  ;;  %178 = vmatprep.subr.mxu1 %v2248_v23  ;;  %v2290_v30 = vld [vmem:[%s3555_s1 + $0xe0] sm:$0xff]  ;;  %v2296_v31 = vld [vmem:[%s3555_s1 + $0x138] sm:$0xff]  ;;  %v2302_v32 = vld [vmem:[%s3555_s1 + $0xc8] sm:$0xff] }
   0xc   :  { %109 = vmatprep.subr.mxu0 %v2201_v15  ;;  %179 = vmatpush1.msra.mxu1 %v2260_v25  ;;  %v2308_v33 = vld [vmem:[%s3555_s1 + $0x130] sm:$0xff]  ;;  %v2314_v34 = vld [vmem:[%s3555_s1 + $0xc0] sm:$0xff]  ;;  %v2320_v35 = vld [vmem:[%s3555_s1 + $0x118] sm:$0xff] }
   0xd   :  { %110 = vmatpush1.msra.mxu0 %v2213_v17  ;;  %180 = vmatprep.subr.mxu1 %v2272_v27  ;;  %v2326_v36 = vld [vmem:[%s3555_s1 + $0xa8] sm:$0xff]  ;;  %v2332_v37 = vld [vmem:[%s3555_s1 + $0x110] sm:$0xff]  ;;  %v2338_v38 = vld [vmem:[%s3555_s1 + $0xa0] sm:$0xff] }
   0xe   :  { %111 = vmatprep.subr.mxu0 %v2230_v20  ;;  %181 = vmatpush1.msra.mxu1 %v2284_v29  ;;  %v2344_v39 = vld [vmem:[%s3555_s1 + $0xf8] sm:$0xff]  ;;  %v2350_v40 = vld [vmem:[%s3555_s1 + $0x88] sm:$0xff]  ;;  %v2356_v41 = vld [vmem:[%s3555_s1 + $0xf0] sm:$0xff] }
   0xf   :  { %112 = vmatpush1.msra.mxu0 %v2242_v22  ;;  %182 = vmatprep.subr.mxu1 %v2296_v31  ;;  %v2362_v42 = vld [vmem:[%s3555_s1 + $0x80] sm:$0xff]  ;;  %v2368_v43 = vld [vmem:[%s3555_s1 + $0xd8] sm:$0xff]  ;;  %v2374_v44 = vld [vmem:[%s3555_s1 + $0x68] sm:$0xff] }
  0x10   :  { %113 = vmatprep.subr.mxu0 %v2254_v24  ;;  %183 = vmatpush1.msra.mxu1 %v2308_v33  ;;  %3628 = vst [vmem:[#allocation6_spill] sm:$0xff] %v2374_v44  ;;  %v2380_v45 = vld [vmem:[%s3555_s1 + $0xd0] sm:$0xff]  ;;  %v2386_v46 = vld [vmem:[%s3555_s1 + $0x60] sm:$0xff]  ;;  %v2392_v47 = vld [vmem:[%s3555_s1 + $0xb8] sm:$0xff] }
  0x11   :  { %114 = vmatpush1.msra.mxu0 %v2266_v26  ;;  %184 = vmatprep.subr.mxu1 %v2320_v35  ;;  %3629 = vst [vmem:[#allocation7_spill] sm:$0xff] %v2386_v46  ;;  %v2398_v48 = vld [vmem:[%s3555_s1 + $0x48] sm:$0xff]  ;;  %v2404_v49 = vld [vmem:[%s3555_s1 + $0xb0] sm:$0xff]  ;;  %v2410_v50 = vld [vmem:[%s3555_s1 + $0x40] sm:$0xff] }
  0x12   :  { %115 = vmatprep.subr.mxu0 %v2278_v28  ;;  %185 = vmatpush1.msra.mxu1 %v2332_v37  ;;  %3630 = vst [vmem:[#allocation8_spill] sm:$0xff] %v2398_v48  ;;  %3631 = vst [vmem:[#allocation9_spill] sm:$0xff] %v2410_v50  ;;  %v2416_v51 = vld [vmem:[%s3555_s1 + $0x98] sm:$0xff]  ;;  %v2422_v52 = vld [vmem:[%s3555_s1 + $0x28] sm:$0xff] }
  0x13   :  { %116 = vmatpush1.msra.mxu0 %v2290_v30  ;;  %186 = vmatprep.subr.mxu1 %v2344_v39  ;;  %3632 = vst [vmem:[#allocation10_spill] sm:$0xff] %v2422_v52  ;;  %v2428_v53 = vld [vmem:[%s3555_s1 + $0x90] sm:$0xff]  ;;  %v2434_v54 = vld [vmem:[%s3555_s1 + $0x20] sm:$0xff]  ;;  %v2440_v55 = vld [vmem:[%s3555_s1 + $0x78] sm:$0xff] }
  0x14   :  { %117 = vmatprep.subr.mxu0 %v2302_v32  ;;  %187 = vmatpush1.msra.mxu1 %v2356_v41  ;;  %3633 = vst [vmem:[#allocation11_spill] sm:$0xff] %v2428_v53  ;;  %3634 = vst [vmem:[#allocation12_spill] sm:$0xff] %v2434_v54  ;;  %v2446_v56 = vld [vmem:[%s3555_s1 + $0x8] sm:$0xff]  ;;  %v2452_v57 = vld [vmem:[%s3555_s1 + $0x70] sm:$0xff] }
  0x15   :  { %118 = vmatpush1.msra.mxu0 %v2314_v34  ;;  %188 = vmatprep.subr.mxu1 %v2368_v43  ;;  %3635 = vst [vmem:[#allocation13_spill] sm:$0xff] %v2440_v55  ;;  %3636 = vst [vmem:[#allocation14_spill] sm:$0xff] %v2446_v56  ;;  %v2458_v58 = vld [vmem:[%s3555_s1] sm:$0xff]  ;;  %v2464_v59 = vld [vmem:[%s3555_s1 + $0x58] sm:$0xff] }
  0x16   :  { %119 = vmatprep.subr.mxu0 %v2326_v36  ;;  %189 = vmatpush1.msra.mxu1 %v2380_v45  ;;  %3637 = vst [vmem:[#allocation15_spill] sm:$0xff] %v2452_v57  ;;  %3638 = vst [vmem:[#allocation16_spill] sm:$0xff] %v2458_v58  ;;  %v2471_v60 = vld [vmem:[%s3555_s1 + $0x50] sm:$0xff]  ;;  %v2478_v61 = vld [vmem:[%s3555_s1 + $0x38] sm:$0xff] }
  0x17   :  { %120 = vmatpush1.msra.mxu0 %v2338_v38  ;;  %190 = vmatprep.subr.mxu1 %v2392_v47  ;;  %3639 = vst [vmem:[#allocation17_spill] sm:$0xff] %v2464_v59  ;;  %3640 = vst [vmem:[#allocation18_spill] sm:$0xff] %v2471_v60  ;;  %v2485_v62 = vld [vmem:[%s3555_s1 + $0x30] sm:$0xff]  ;;  %v2492_v63 = vld [vmem:[%s3555_s1 + $0x18] sm:$0xff] }
  0x18   :  { %121 = vmatprep.subr.mxu0 %v2350_v40  ;;  %191 = vmatpush1.msra.mxu1 %v2404_v49  ;;  %3641 = vst [vmem:[#allocation19_spill] sm:$0xff] %v2478_v61  ;;  %3642 = vst [vmem:[#allocation20_spill] sm:$0xff] %v2485_v62 }
  0x19   :  { %122 = vmatpush1.msra.mxu0 %v2362_v42  ;;  %192 = vmatprep.subr.mxu1 %v2416_v51  ;;  %3643 = vst [vmem:[#allocation21_spill] sm:$0xff] %v2492_v63 }
  0x1a   :  { %123 = vmatprep.subr.mxu0 %v2374_v44  ;;  %193 = vmatpush1.msra.mxu1 %v2428_v53 }
  0x1b   :  { %124 = vmatpush1.msra.mxu0 %v2386_v46  ;;  %194 = vmatprep.subr.mxu1 %v2440_v55 }
  0x1c   :  { %125 = vmatprep.subr.mxu0 %v2398_v48  ;;  %195 = vmatpush1.msra.mxu1 %v2452_v57 }
  0x1d   :  { %126 = vmatpush1.msra.mxu0 %v2410_v50  ;;  %196 = vmatprep.subr.mxu1 %v2464_v59 }
  0x1e   :  { %127 = vmatprep.subr.mxu0 %v2422_v52  ;;  %197 = vmatpush1.msra.mxu1 %v2471_v60 }
  0x1f   :  { %128 = vmatpush1.msra.mxu0 %v2434_v54  ;;  %198 = vmatprep.subr.mxu1 %v2478_v61 }
  0x20   :  { %129 = vmatprep.subr.mxu0 %v2446_v56  ;;  %199 = vmatpush1.msra.mxu1 %v2485_v62 }
  0x21   :  { %130 = vmatpush1.msra.mxu0 %v2458_v58  ;;  %v2498_v58 = vld [vmem:[%s3555_s1 + $0x10] sm:$0xff]  ;;  %200 = vmatprep.subr.mxu1 %v2492_v63 }
  0x22   :  { %164 = vmatmul.mubr.f32.vlgmr.msra.gmra.mxu0 %v3564_v3  ;;  %3644 = vst [vmem:[#allocation22_spill] sm:$0xff] %v2498_v58  ;;  %274 = vmatprep.subr.mxu0 %v2119_v0 }
  0x23   :  { %275 = vmatpush1.msra.mxu0 %v2124_v1  ;;  %201 = vmatpush1.msra.mxu1 %v2498_v58 }
  0x24   :  { %276 = vmatprep.subr.mxu0 %v2129_v2  ;;  %235 = vmatmul.mubr.f32.vlgmr.msra.gmra.mxu1 %v3564_v3  ;;  %v3645_v3 = vld [vmem:[#allocation16_spill] sm:$0xff] }
  0x25   :  { %277 = vmatpush1.msra.mxu0 %v2137_v4  ;;  %345 = vmatprep.subr.mxu1 %v2166_v9 }
  0x26   :  { %346 = vmatpush1.msra.mxu1 %v2178_v11  ;;  %278 = vmatprep.subr.mxu0 %v2143_v5 }
  0x27   :  { %347 = vmatprep.subr.mxu1 %v2190_v13  ;;  %279 = vmatpush1.msra.mxu0 %v2149_v6 }
  0x28   :  { %348 = vmatpush1.msra.mxu1 %v2195_v14  ;;  %280 = vmatprep.subr.mxu0 %v2155_v7 }
  0x29   :  { %349 = vmatprep.subr.mxu1 %v2207_v16  ;;  %281 = vmatpush1.msra.mxu0 %v2161_v8 }
  0x2a   :  { %350 = vmatpush1.msra.mxu1 %v2219_v18  ;;  %282 = vmatprep.subr.mxu0 %v2172_v10 }
  0x2b   :  { %351 = vmatprep.subr.mxu1 %v2224_v19  ;;  %283 = vmatpush1.msra.mxu0 %v2184_v12 }
  0x2c   :  { %352 = vmatpush1.msra.mxu1 %v2236_v21  ;;  %284 = vmatprep.subr.mxu0 %v2201_v15 }
  0x2d   :  { %353 = vmatprep.subr.mxu1 %v2248_v23  ;;  %285 = vmatpush1.msra.mxu0 %v2213_v17 }
  0x2e   :  { %354 = vmatpush1.msra.mxu1 %v2260_v25  ;;  %286 = vmatprep.subr.mxu0 %v2230_v20 }
  0x2f   :  { %355 = vmatprep.subr.mxu1 %v2272_v27  ;;  %287 = vmatpush1.msra.mxu0 %v2242_v22 }
  0x30   :  { %356 = vmatpush1.msra.mxu1 %v2284_v29  ;;  %288 = vmatprep.subr.mxu0 %v2254_v24 }
  0x31   :  { %357 = vmatprep.subr.mxu1 %v2296_v31  ;;  %289 = vmatpush1.msra.mxu0 %v2266_v26 }
  0x32   :  { %358 = vmatpush1.msra.mxu1 %v2308_v33  ;;  %290 = vmatprep.subr.mxu0 %v2278_v28 }
  0x33   :  { %359 = vmatprep.subr.mxu1 %v2320_v35  ;;  %291 = vmatpush1.msra.mxu0 %v2290_v30 }
  0x34   :  { %360 = vmatpush1.msra.mxu1 %v2332_v37  ;;  %292 = vmatprep.subr.mxu0 %v2302_v32 }
  0x35   :  { %361 = vmatprep.subr.mxu1 %v2344_v39  ;;  %293 = vmatpush1.msra.mxu0 %v2314_v34 }
  0x36   :  { %362 = vmatpush1.msra.mxu1 %v2356_v41  ;;  %294 = vmatprep.subr.mxu0 %v2326_v36 }
  0x37   :  { %363 = vmatprep.subr.mxu1 %v2368_v43  ;;  %295 = vmatpush1.msra.mxu0 %v2338_v38 }
  0x38   :  { %364 = vmatpush1.msra.mxu1 %v2380_v45  ;;  %296 = vmatprep.subr.mxu0 %v2350_v40 }
  0x39   :  { %365 = vmatprep.subr.mxu1 %v2392_v47  ;;  %297 = vmatpush1.msra.mxu0 %v2362_v42 }
  0x3a   :  { %366 = vmatpush1.msra.mxu1 %v2404_v49  ;;  %298 = vmatprep.subr.mxu0 %v2374_v44 }
  0x3b   :  { %367 = vmatprep.subr.mxu1 %v2416_v51  ;;  %299 = vmatpush1.msra.mxu0 %v2386_v46 }
  0x3c   :  { %368 = vmatpush1.msra.mxu1 %v2428_v53  ;;  %300 = vmatprep.subr.mxu0 %v2398_v48  ;;  %v3646_v48 = vmov 0.0  }
  0x3d   :  { %369 = vmatprep.subr.mxu1 %v2440_v55  ;;  %301 = vmatpush1.msra.mxu0 %v2410_v50 }
  0x3e   :  { %370 = vmatpush1.msra.mxu1 %v2452_v57  ;;  %302 = vmatprep.subr.mxu0 %v2422_v52 }
  0x3f   :  { %371 = vmatprep.subr.mxu1 %v2464_v59  ;;  %303 = vmatpush1.msra.mxu0 %v2434_v54 }
  0x40   :  { %372 = vmatpush1.msra.mxu1 %v2471_v60  ;;  %304 = vmatprep.subr.mxu0 %v2446_v56  ;;  %v31_v56 = vld [vmem:[%s3556_s0] sm:$0xff]  ;;  %v33_v60 = vld [vmem:[%s3556_s0 + $0x10] sm:$0xff] }
  0x41   :  { %373 = vmatprep.subr.mxu1 %v2478_v61  ;;  %305 = vmatpush1.msra.mxu0 %v3645_v3  ;;  %v32_v3 = vld [vmem:[%s3556_s0 + $0x8] sm:$0xff] }
  0x42   :  { %374 = vmatpush1.msra.mxu1 %v2485_v62  ;;  %338 = vmatprep.mubr.f32.mxu0 %v3646_v48 }
  0x43   :  { %375 = vmatprep.subr.mxu1 %v2492_v63  ;;  %409 = vmatprep.mubr.f32.mxu1 %v3646_v48 }
  0x44   :  { %376 = vmatpush1.msra.mxu1 %v2498_v58  ;;  %449 = vmatprep.subr.mxu0 %v2119_v0 }
  0x45   :  { %520 = vmatprep.subr.mxu1 %v2166_v9  ;;  %v34_v9 = vld [vmem:[%s3556_s0 + $0x18] sm:$0xff] }
  0xe2   :  { %v165_v54 = vpop.f32.mrf.mxu0 }
  0xe3   :  { %v241_v62 = vadd.f32 %v165_v54, %v31_v56 }
  0xe4   :  { %v167_v61 = vpop.f32.mrf.mxu0  ;;  %v236_v58 = vpop.f32.mrf.mxu1 }
  0xe5   :  { %v1709_v63 = vmul.f32 -1.442695, %v241_v62  ;;  %v242_v52 = vadd.f32 %v167_v61, %v32_v3  ;;  %v243_v59 = vadd.f32 %v236_v58, %v33_v60  ;;  %v3651_v58 = vld [vmem:[#allocation15_spill] sm:$0xff]  ;;  %v3653_v60 = vld [vmem:[#allocation17_spill] sm:$0xff] }
  0xe6   :  { %v238_v0 = vpop.f32.mrf.mxu1 }
  0xe7   :  { %1871 = vpow2.f32 %v1709_v63  ;;  %v1710_v48 = vmul.f32 -1.442695, %v242_v52  ;;  %v244_v50 = vadd.f32 %v238_v0, %v34_v9 }
  0xe9   :  { %1873 = vpow2.f32 %v1710_v48  ;;  %v1711_v57 = vmul.f32 -1.442695, %v244_v50 }
  0xea   :  { %1875 = vtanh.f32 %v243_v59  ;;  %v3652_v59 = vld [vmem:[#allocation8_spill] sm:$0xff] }
  0xeb   :  { %1877 = vpow2.f32 %v1711_v57  ;;  %v3650_v57 = vld [vmem:[#allocation7_spill] sm:$0xff] }
  0xf4   :  { %v1872_v54 = vpop.eup %1871 }
  0xf5   :  { %v248_v56 = vadd.f32 1.0, %v1872_v54  ;;  %v3654_v54 = vld [vmem:[#allocation9_spill] sm:$0xff] }
  0xf6   :  { %v1874_v3 = vpop.eup %1873 }
  0xf7   :  { %1879 = vrcp.f32 %v248_v56  ;;  %v254_v52 = vadd.f32 1.0, %v1874_v3  ;;  %v1876_v48 = vpop.eup %1875  ;;  %v3655_v56 = vld [vmem:[#allocation18_spill] sm:$0xff] }
  0xf8   :  { %v1878_v61 = vpop.eup %1877  ;;  %v3656_v3 = vld [vmem:[#allocation10_spill] sm:$0xff] }
  0xf9   :  { %1881 = vrcp.f32 %v254_v52  ;;  %v261_v46 = vadd.f32 1.0, %v1878_v61  ;;  %v3657_v52 = vld [vmem:[#allocation19_spill] sm:$0xff]  ;;  %v3659_v61 = vld [vmem:[#allocation20_spill] sm:$0xff] }
  0xfb   :  { %1883 = vrcp.f32 %v261_v46  ;;  %v3648_v46 = vld [vmem:[#allocation6_spill] sm:$0xff] }
 0x104   :  { %v1880_v62 = vpop.eup %1879 }
 0x105   :  { %v265_v44 = vmul.f32 %v1880_v62, %v1876_v48  ;;  %v3658_v48 = vld [vmem:[#allocation12_spill] sm:$0xff]  ;;  %v3660_v62 = vld [vmem:[#allocation14_spill] sm:$0xff] }
 0x106   :  { %v1882_v63 = vpop.eup %1881 }
 0x107   :  { %v264_v55 = vmul.f32 0.0, %v1882_v63  ;;  %v3661_v63 = vld [vmem:[#allocation21_spill] sm:$0xff] }
 0x108   :  { %v1884_v0 = vpop.eup %1883 }
 0x109   :  { %v2584_v53 = vadd.f32 %v265_v44, %v264_v55  ;;  %v3647_v44 = vld [vmem:[#allocation11_spill] sm:$0xff]  ;;  %v3649_v55 = vld [vmem:[#allocation13_spill] sm:$0xff] }
 0x10b   :  { %1885 = vtanh.f32 %v2584_v53 }
 0x118   :  { %v1886_v9 = vpop.eup %1885 }
 0x119   :  { %v268_v50 = vmul.f32 %v1886_v9, %v1884_v0  ;;  %v3662_v0 = vld [vmem:[#allocation16_spill] sm:$0xff]  ;;  %v3663_v9 = vmov 0.0  }
 0x11b   :  { %339 = vmatmul.mubr.f32.vlgmr.msra.gmra.mxu0 %v268_v50  ;;  %410 = vmatmul.mubr.f32.vlgmr.msra.gmra.mxu1 %v268_v50  ;;  %v3664_v50 = vld [vmem:[#allocation22_spill] sm:$0xff] }
 0x11c   :  { %450 = vmatpush1.msra.mxu0 %v2124_v1  ;;  %521 = vmatpush1.msra.mxu1 %v2178_v11 }
 0x11d   :  { %451 = vmatprep.subr.mxu0 %v2129_v2  ;;  %522 = vmatprep.subr.mxu1 %v2190_v13 }
 0x11e   :  { %452 = vmatpush1.msra.mxu0 %v2137_v4  ;;  %523 = vmatpush1.msra.mxu1 %v2195_v14 }
 0x11f   :  { %453 = vmatprep.subr.mxu0 %v2143_v5  ;;  %524 = vmatprep.subr.mxu1 %v2207_v16 }
 0x120   :  { %454 = vmatpush1.msra.mxu0 %v2149_v6  ;;  %525 = vmatpush1.msra.mxu1 %v2219_v18 }
 0x121   :  { %455 = vmatprep.subr.mxu0 %v2155_v7  ;;  %526 = vmatprep.subr.mxu1 %v2224_v19 }
 0x122   :  { %456 = vmatpush1.msra.mxu0 %v2161_v8  ;;  %527 = vmatpush1.msra.mxu1 %v2236_v21 }
 0x123   :  { %457 = vmatprep.subr.mxu0 %v2172_v10  ;;  %528 = vmatprep.subr.mxu1 %v2248_v23 }
 0x124   :  { %458 = vmatpush1.msra.mxu0 %v2184_v12  ;;  %529 = vmatpush1.msra.mxu1 %v2260_v25 }
 0x125   :  { %459 = vmatprep.subr.mxu0 %v2201_v15  ;;  %530 = vmatprep.subr.mxu1 %v2272_v27 }
 0x126   :  { %460 = vmatpush1.msra.mxu0 %v2213_v17  ;;  %531 = vmatpush1.msra.mxu1 %v2284_v29 }
 0x127   :  { %461 = vmatprep.subr.mxu0 %v2230_v20  ;;  %532 = vmatprep.subr.mxu1 %v2296_v31 }
 0x128   :  { %462 = vmatpush1.msra.mxu0 %v2242_v22  ;;  %533 = vmatpush1.msra.mxu1 %v2308_v33 }
 0x129   :  { %463 = vmatprep.subr.mxu0 %v2254_v24  ;;  %534 = vmatprep.subr.mxu1 %v2320_v35 }
 0x12a   :  { %464 = vmatpush1.msra.mxu0 %v2266_v26  ;;  %535 = vmatpush1.msra.mxu1 %v2332_v37 }
 0x12b   :  { %465 = vmatprep.subr.mxu0 %v2278_v28  ;;  %536 = vmatprep.subr.mxu1 %v2344_v39 }
 0x12c   :  { %466 = vmatpush1.msra.mxu0 %v2290_v30  ;;  %537 = vmatpush1.msra.mxu1 %v2356_v41 }
 0x12d   :  { %467 = vmatprep.subr.mxu0 %v2302_v32  ;;  %538 = vmatprep.subr.mxu1 %v2368_v43 }
 0x12e   :  { %468 = vmatpush1.msra.mxu0 %v2314_v34  ;;  %539 = vmatpush1.msra.mxu1 %v2380_v45 }
 0x12f   :  { %469 = vmatprep.subr.mxu0 %v2326_v36  ;;  %540 = vmatprep.subr.mxu1 %v2392_v47 }
 0x130   :  { %470 = vmatpush1.msra.mxu0 %v2338_v38  ;;  %541 = vmatpush1.msra.mxu1 %v2404_v49 }
 0x131   :  { %471 = vmatprep.subr.mxu0 %v2350_v40  ;;  %542 = vmatprep.subr.mxu1 %v2416_v51 }
 0x132   :  { %472 = vmatpush1.msra.mxu0 %v2362_v42  ;;  %543 = vmatpush1.msra.mxu1 %v3647_v44 }
 0x133   :  { %473 = vmatprep.subr.mxu0 %v3648_v46  ;;  %544 = vmatprep.subr.mxu1 %v3649_v55 }
 0x134   :  { %474 = vmatpush1.msra.mxu0 %v3650_v57  ;;  %545 = vmatpush1.msra.mxu1 %v3651_v58 }
 0x135   :  { %475 = vmatprep.subr.mxu0 %v3652_v59  ;;  %546 = vmatprep.subr.mxu1 %v3653_v60  ;;  %v1714_v59 = vld [vmem:[%s3556_s0 + $0x30] sm:$0xff] }
 0x136   :  { %476 = vmatpush1.msra.mxu0 %v3654_v54  ;;  %547 = vmatpush1.msra.mxu1 %v3655_v56  ;;  %v3665_v56 = vld [vmem:[#allocation4_spill] sm:$0xff] }
 0x137   :  { %477 = vmatprep.subr.mxu0 %v3656_v3  ;;  %548 = vmatprep.subr.mxu1 %v3657_v52  ;;  %v3666_v3 = vld [vmem:[#allocation5_spill] sm:$0xff] }
 0x138   :  { %478 = vmatpush1.msra.mxu0 %v3658_v48  ;;  %549 = vmatpush1.msra.mxu1 %v3659_v61  ;;  %v1712_v61 = vld [vmem:[%s3556_s0 + $0x20] sm:$0xff] }
 0x139   :  { %479 = vmatprep.subr.mxu0 %v3660_v62  ;;  %550 = vmatprep.subr.mxu1 %v3661_v63  ;;  %v1713_v63 = vld [vmem:[%s3556_s0 + $0x28] sm:$0xff] }
 0x13a   :  { %480 = vmatpush1.msra.mxu0 %v3662_v0  ;;  %513 = vmatprep.mubr.f32.mxu0 %v3663_v9 }
 0x13b   :  { %551 = vmatpush1.msra.mxu1 %v3664_v50  ;;  %584 = vmatprep.mubr.f32.mxu1 %v3663_v9 }
 0x13c   :  { %624 = vmatprep.subr.mxu0 %v3665_v56  ;;  %695 = vmatprep.subr.mxu1 %v3666_v3  ;;  %v1715_v3 = vld [vmem:[%s3556_s0 + $0x38] sm:$0xff] }
 0x1db   :  { %v340_v48 = vpop.f32.mrf.mxu0  ;;  %v411_v50 = vpop.f32.mrf.mxu1 }
 0x1dc   :  { %v416_v0 = vadd.f32 %v1712_v61, %v340_v48  ;;  %v418_v48 = vadd.f32 %v1714_v59, %v411_v50  ;;  %v3670_v50 = vld [vmem:[#allocation15_spill] sm:$0xff] }
 0x1dd   :  { %v342_v62 = vpop.f32.mrf.mxu0  ;;  %v413_v56 = vpop.f32.mrf.mxu1 }
 0x1de   :  { %v1716_v52 = vmul.f32 -1.442695, %v416_v0  ;;  %v417_v54 = vadd.f32 %v1713_v63, %v342_v62  ;;  %v419_v60 = vadd.f32 %v1715_v3, %v413_v56 }
 0x1e0   :  { %1887 = vpow2.f32 %v1716_v52  ;;  %v1717_v9 = vmul.f32 -1.442695, %v417_v54  ;;  %v1718_v58 = vmul.f32 -1.442695, %v419_v60  ;;  %v3669_v60 = vld [vmem:[#allocation7_spill] sm:$0xff] }
 0x1e2   :  { %1889 = vpow2.f32 %v1717_v9 }
 0x1e3   :  { %1891 = vpow2.f32 %v1718_v58 }
 0x1ed   :  { %v1888_v57 = vpop.eup %1887 }
 0x1ee   :  { %v423_v61 = vadd.f32 1.0, %v1888_v57 }
 0x1ef   :  { %v1890_v0 = vpop.eup %1889 }
 0x1f0   :  { %1893 = vrcp.f32 %v423_v61  ;;  %v429_v52 = vadd.f32 1.0, %v1890_v0  ;;  %v1892_v54 = vpop.eup %1891  ;;  %v3672_v61 = vld [vmem:[#allocation17_spill] sm:$0xff] }
 0x1f1   :  { %1895 = vtanh.f32 %v418_v48  ;;  %v436_v55 = vadd.f32 1.0, %v1892_v54  ;;  %v3671_v48 = vld [vmem:[#allocation8_spill] sm:$0xff]  ;;  %v3673_v0 = vld [vmem:[#allocation9_spill] sm:$0xff]  ;;  %v3675_v54 = vld [vmem:[#allocation10_spill] sm:$0xff] }
 0x1f2   :  { %1897 = vrcp.f32 %v429_v52  ;;  %v3674_v52 = vld [vmem:[#allocation18_spill] sm:$0xff] }
 0x1f3   :  { %1899 = vrcp.f32 %v436_v55  ;;  %v3668_v55 = vld [vmem:[#allocation13_spill] sm:$0xff] }
 0x1fd   :  { %v1894_v62 = vpop.eup %1893 }
 0x1fe   :  { %v1896_v63 = vpop.eup %1895 }
 0x1ff   :  { %v1898_v9 = vpop.eup %1897  ;;  %v440_v56 = vmul.f32 %v1896_v63, %v1894_v62  ;;  %v3676_v62 = vld [vmem:[#allocation19_spill] sm:$0xff]  ;;  %v3677_v63 = vld [vmem:[#allocation12_spill] sm:$0xff] }
 0x200   :  { %v439_v3 = vmul.f32 %v1898_v9, %v2584_v53  ;;  %v1900_v57 = vpop.eup %1899  ;;  %v3667_v53 = vld [vmem:[#allocation6_spill] sm:$0xff]  ;;  %v3678_v9 = vld [vmem:[#allocation20_spill] sm:$0xff] }
 0x202   :  { %v2666_v46 = vadd.f32 %v440_v56, %v439_v3  ;;  %v3679_v56 = vld [vmem:[#allocation14_spill] sm:$0xff]  ;;  %v3680_v3 = vld [vmem:[#allocation21_spill] sm:$0xff] }
 0x204   :  { %1901 = vtanh.f32 %v2666_v46 }
 0x211   :  { %v1902_v59 = vpop.eup %1901 }
 0x212   :  { %v443_v58 = vmul.f32 %v1902_v59, %v1900_v57  ;;  %v3681_v57 = vld [vmem:[#allocation16_spill] sm:$0xff]  ;;  %v3682_v59 = vmov 0.0  }
 0x214   :  { %514 = vmatmul.mubr.f32.vlgmr.msra.gmra.mxu0 %v443_v58  ;;  %585 = vmatmul.mubr.f32.vlgmr.msra.gmra.mxu1 %v443_v58  ;;  %v3683_v58 = vld [vmem:[#allocation22_spill] sm:$0xff] }
 0x215   :  { %625 = vmatpush1.msra.mxu0 %v2124_v1  ;;  %696 = vmatpush1.msra.mxu1 %v2178_v11 }
 0x216   :  { %626 = vmatprep.subr.mxu0 %v2129_v2  ;;  %697 = vmatprep.subr.mxu1 %v2190_v13 }
 0x217   :  { %627 = vmatpush1.msra.mxu0 %v2137_v4  ;;  %698 = vmatpush1.msra.mxu1 %v2195_v14 }
 0x218   :  { %628 = vmatprep.subr.mxu0 %v2143_v5  ;;  %699 = vmatprep.subr.mxu1 %v2207_v16 }
 0x219   :  { %629 = vmatpush1.msra.mxu0 %v2149_v6  ;;  %700 = vmatpush1.msra.mxu1 %v2219_v18 }
 0x21a   :  { %630 = vmatprep.subr.mxu0 %v2155_v7  ;;  %701 = vmatprep.subr.mxu1 %v2224_v19 }
 0x21b   :  { %631 = vmatpush1.msra.mxu0 %v2161_v8  ;;  %702 = vmatpush1.msra.mxu1 %v2236_v21 }
 0x21c   :  { %632 = vmatprep.subr.mxu0 %v2172_v10  ;;  %703 = vmatprep.subr.mxu1 %v2248_v23 }
 0x21d   :  { %633 = vmatpush1.msra.mxu0 %v2184_v12  ;;  %704 = vmatpush1.msra.mxu1 %v2260_v25 }
 0x21e   :  { %634 = vmatprep.subr.mxu0 %v2201_v15  ;;  %705 = vmatprep.subr.mxu1 %v2272_v27 }
 0x21f   :  { %635 = vmatpush1.msra.mxu0 %v2213_v17  ;;  %706 = vmatpush1.msra.mxu1 %v2284_v29 }
 0x220   :  { %636 = vmatprep.subr.mxu0 %v2230_v20  ;;  %707 = vmatprep.subr.mxu1 %v2296_v31 }
 0x221   :  { %637 = vmatpush1.msra.mxu0 %v2242_v22  ;;  %708 = vmatpush1.msra.mxu1 %v2308_v33 }
 0x222   :  { %638 = vmatprep.subr.mxu0 %v2254_v24  ;;  %709 = vmatprep.subr.mxu1 %v2320_v35 }
 0x223   :  { %639 = vmatpush1.msra.mxu0 %v2266_v26  ;;  %710 = vmatpush1.msra.mxu1 %v2332_v37 }
 0x224   :  { %640 = vmatprep.subr.mxu0 %v2278_v28  ;;  %711 = vmatprep.subr.mxu1 %v2344_v39 }
 0x225   :  { %641 = vmatpush1.msra.mxu0 %v2290_v30  ;;  %712 = vmatpush1.msra.mxu1 %v2356_v41 }
 0x226   :  { %642 = vmatprep.subr.mxu0 %v2302_v32  ;;  %713 = vmatprep.subr.mxu1 %v2368_v43 }
 0x227   :  { %643 = vmatpush1.msra.mxu0 %v2314_v34  ;;  %714 = vmatpush1.msra.mxu1 %v2380_v45 }
 0x228   :  { %644 = vmatprep.subr.mxu0 %v2326_v36  ;;  %715 = vmatprep.subr.mxu1 %v2392_v47 }
 0x229   :  { %645 = vmatpush1.msra.mxu0 %v2338_v38  ;;  %716 = vmatpush1.msra.mxu1 %v2404_v49 }
 0x22a   :  { %646 = vmatprep.subr.mxu0 %v2350_v40  ;;  %717 = vmatprep.subr.mxu1 %v2416_v51 }
 0x22b   :  { %647 = vmatpush1.msra.mxu0 %v2362_v42  ;;  %718 = vmatpush1.msra.mxu1 %v3647_v44 }
 0x22c   :  { %648 = vmatprep.subr.mxu0 %v3667_v53  ;;  %719 = vmatprep.subr.mxu1 %v3668_v55 }
 0x22d   :  { %649 = vmatpush1.msra.mxu0 %v3669_v60  ;;  %720 = vmatpush1.msra.mxu1 %v3670_v50 }
 0x22e   :  { %650 = vmatprep.subr.mxu0 %v3671_v48  ;;  %721 = vmatprep.subr.mxu1 %v3672_v61  ;;  %v1721_v48 = vld [vmem:[%s3556_s0 + $0x50] sm:$0xff] }
 0x22f   :  { %651 = vmatpush1.msra.mxu0 %v3673_v0  ;;  %722 = vmatpush1.msra.mxu1 %v3674_v52  ;;  %v3684_v52 = vld [vmem:[#allocation4_spill] sm:$0xff] }
 0x230   :  { %652 = vmatprep.subr.mxu0 %v3675_v54  ;;  %723 = vmatprep.subr.mxu1 %v3676_v62  ;;  %v3685_v54 = vld [vmem:[#allocation5_spill] sm:$0xff] }
 0x231   :  { %653 = vmatpush1.msra.mxu0 %v3677_v63  ;;  %724 = vmatpush1.msra.mxu1 %v3678_v9  ;;  %v1719_v9 = vld [vmem:[%s3556_s0 + $0x40] sm:$0xff] }
 0x232   :  { %654 = vmatprep.subr.mxu0 %v3679_v56  ;;  %725 = vmatprep.subr.mxu1 %v3680_v3  ;;  %v1720_v3 = vld [vmem:[%s3556_s0 + $0x48] sm:$0xff] }
 0x233   :  { %655 = vmatpush1.msra.mxu0 %v3681_v57  ;;  %688 = vmatprep.mubr.f32.mxu0 %v3682_v59 }
 0x234   :  { %726 = vmatpush1.msra.mxu1 %v3683_v58  ;;  %759 = vmatprep.mubr.f32.mxu1 %v3682_v59 }
 0x235   :  { %799 = vmatprep.subr.mxu0 %v3684_v52  ;;  %870 = vmatprep.subr.mxu1 %v3685_v54  ;;  %v1722_v52 = vld [vmem:[%s3556_s0 + $0x58] sm:$0xff] }
 0x2d4   :  { %v515_v63 = vpop.f32.mrf.mxu0  ;;  %v586_v58 = vpop.f32.mrf.mxu1 }
 0x2d5   :  { %v591_v57 = vadd.f32 %v1719_v9, %v515_v63  ;;  %v593_v63 = vadd.f32 %v1721_v48, %v586_v58 }
 0x2d6   :  { %v517_v56 = vpop.f32.mrf.mxu0  ;;  %v588_v54 = vpop.f32.mrf.mxu1 }
 0x2d7   :  { %v1723_v62 = vmul.f32 -1.442695, %v591_v57  ;;  %v592_v0 = vadd.f32 %v1720_v3, %v517_v56  ;;  %v594_v61 = vadd.f32 %v1722_v52, %v588_v54 }
 0x2d9   :  { %1903 = vpow2.f32 %v1723_v62  ;;  %v1724_v59 = vmul.f32 -1.442695, %v592_v0  ;;  %v1725_v50 = vmul.f32 -1.442695, %v594_v61 }
 0x2db   :  { %1905 = vpow2.f32 %v1724_v59 }
 0x2dc   :  { %1907 = vpow2.f32 %v1725_v50 }
 0x2e6   :  { %v1904_v60 = vpop.eup %1903 }
 0x2e7   :  { %v598_v9 = vadd.f32 1.0, %v1904_v60 }
 0x2e8   :  { %v1906_v57 = vpop.eup %1905 }
 0x2e9   :  { %1909 = vrcp.f32 %v598_v9  ;;  %v604_v62 = vadd.f32 1.0, %v1906_v57  ;;  %v1908_v0 = vpop.eup %1907 }
 0x2ea   :  { %1911 = vtanh.f32 %v593_v63  ;;  %v611_v55 = vadd.f32 1.0, %v1908_v0  ;;  %v2841_v0 = vld [vmem:[%s3555_s1 + $0x1e0] sm:$0xff] }
 0x2eb   :  { %1913 = vrcp.f32 %v604_v62 }
 0x2ec   :  { %1915 = vrcp.f32 %v611_v55 }
 0x2f6   :  { %v1910_v56 = vpop.eup %1909 }
 0x2f7   :  { %v1912_v3 = vpop.eup %1911 }
 0x2f8   :  { %v1914_v59 = vpop.eup %1913  ;;  %v615_v54 = vmul.f32 %v1912_v3, %v1910_v56  ;;  %v2853_v56 = vld [vmem:[%s3555_s1 + $0x1c8] sm:$0xff]  ;;  %v2859_v3 = vld [vmem:[%s3555_s1 + $0x1d8] sm:$0xff] }
 0x2f9   :  { %v614_v52 = vmul.f32 %v1914_v59, %v2666_v46  ;;  %v1916_v60 = vpop.eup %1915  ;;  %v2865_v59 = vld [vmem:[%s3555_s1 + $0x1c0] sm:$0xff] }
 0x2fb   :  { %v2748_v53 = vadd.f32 %v615_v54, %v614_v52  ;;  %v2871_v54 = vld [vmem:[%s3555_s1 + $0x1d0] sm:$0xff]  ;;  %v2877_v52 = vld [vmem:[%s3555_s1 + $0x1a8] sm:$0xff] }
 0x2fd   :  { %1917 = vtanh.f32 %v2748_v53 }
 0x30a   :  { %v1918_v48 = vpop.eup %1917 }
 0x30b   :  { %v618_v50 = vmul.f32 %v1918_v48, %v1916_v60  ;;  %v2883_v60 = vld [vmem:[%s3555_s1 + $0x1b8] sm:$0xff]  ;;  %v2889_v48 = vld [vmem:[%s3555_s1 + $0x1a0] sm:$0xff] }
 0x30d   :  { %689 = vmatmul.mubr.f32.vlgmr.msra.gmra.mxu0 %v618_v50  ;;  %760 = vmatmul.mubr.f32.vlgmr.msra.gmra.mxu1 %v618_v50  ;;  %v2895_v50 = vld [vmem:[%s3555_s1 + $0x1b0] sm:$0xff] }
 0x30e   :  { %800 = vmatpush1.msra.mxu0 %v2124_v1  ;;  %871 = vmatpush1.msra.mxu1 %v2178_v11  ;;  %v3686_v1 = vld [vmem:[#allocation6_spill] sm:$0xff] }
 0x30f   :  { %801 = vmatprep.subr.mxu0 %v2129_v2  ;;  %872 = vmatprep.subr.mxu1 %v2190_v13  ;;  %v3687_v2 = vld [vmem:[#allocation13_spill] sm:$0xff]  ;;  %v3694_v11 = vld [vmem:[#allocation10_spill] sm:$0xff]  ;;  %v3696_v13 = vld [vmem:[#allocation12_spill] sm:$0xff] }
 0x310   :  { %802 = vmatpush1.msra.mxu0 %v2137_v4  ;;  %873 = vmatpush1.msra.mxu1 %v2195_v14  ;;  %v3688_v4 = vld [vmem:[#allocation7_spill] sm:$0xff]  ;;  %v3697_v14 = vld [vmem:[#allocation20_spill] sm:$0xff] }
 0x311   :  { %803 = vmatprep.subr.mxu0 %v2143_v5  ;;  %874 = vmatprep.subr.mxu1 %v2207_v16  ;;  %v3689_v5 = vld [vmem:[#allocation15_spill] sm:$0xff]  ;;  %v3699_v16 = vld [vmem:[#allocation21_spill] sm:$0xff] }
 0x312   :  { %804 = vmatpush1.msra.mxu0 %v2149_v6  ;;  %875 = vmatpush1.msra.mxu1 %v2219_v18  ;;  %v3690_v6 = vld [vmem:[#allocation8_spill] sm:$0xff]  ;;  %v3701_v18 = vmov 0.0  }
 0x313   :  { %805 = vmatprep.subr.mxu0 %v2155_v7  ;;  %876 = vmatprep.subr.mxu1 %v2224_v19  ;;  %v3691_v7 = vld [vmem:[#allocation17_spill] sm:$0xff]  ;;  %v3702_v19 = vld [vmem:[#allocation22_spill] sm:$0xff] }
 0x314   :  { %806 = vmatpush1.msra.mxu0 %v2161_v8  ;;  %877 = vmatpush1.msra.mxu1 %v2236_v21  ;;  %v3692_v8 = vld [vmem:[#allocation9_spill] sm:$0xff] }
 0x315   :  { %807 = vmatprep.subr.mxu0 %v2172_v10  ;;  %878 = vmatprep.subr.mxu1 %v2248_v23  ;;  %v3693_v10 = vld [vmem:[#allocation18_spill] sm:$0xff]  ;;  %v3704_v21 = vld [vmem:[#allocation5_spill] sm:$0xff] }
 0x316   :  { %808 = vmatpush1.msra.mxu0 %v2184_v12  ;;  %879 = vmatpush1.msra.mxu1 %v2260_v25  ;;  %v3695_v12 = vld [vmem:[#allocation19_spill] sm:$0xff] }
 0x317   :  { %809 = vmatprep.subr.mxu0 %v2201_v15  ;;  %880 = vmatprep.subr.mxu1 %v2272_v27  ;;  %v3698_v15 = vld [vmem:[#allocation14_spill] sm:$0xff] }
 0x318   :  { %810 = vmatpush1.msra.mxu0 %v2213_v17  ;;  %881 = vmatpush1.msra.mxu1 %v2284_v29  ;;  %v3700_v17 = vld [vmem:[#allocation16_spill] sm:$0xff] }
 0x319   :  { %811 = vmatprep.subr.mxu0 %v2230_v20  ;;  %882 = vmatprep.subr.mxu1 %v2296_v31  ;;  %v2818_v20 = vld [vmem:[%s3555_s1 + $0x1e8] sm:$0xff]  ;;  %v1729_v31 = vld [vmem:[%s3556_s0 + $0x78] sm:$0xff] }
 0x31a   :  { %812 = vmatpush1.msra.mxu0 %v2242_v22  ;;  %883 = vmatpush1.msra.mxu1 %v2308_v33  ;;  %3703 = vst [vmem:[#allocation11_spill] sm:$0xff] %v2818_v20  ;;  %v1726_v22 = vld [vmem:[%s3556_s0 + $0x60] sm:$0xff] }
 0x31b   :  { %813 = vmatprep.subr.mxu0 %v2254_v24  ;;  %884 = vmatprep.subr.mxu1 %v2320_v35  ;;  %v1727_v24 = vld [vmem:[%s3556_s0 + $0x68] sm:$0xff] }
 0x31c   :  { %814 = vmatpush1.msra.mxu0 %v2266_v26  ;;  %885 = vmatpush1.msra.mxu1 %v2332_v37 }
 0x31d   :  { %815 = vmatprep.subr.mxu0 %v2278_v28  ;;  %886 = vmatprep.subr.mxu1 %v2344_v39 }
 0x31e   :  { %816 = vmatpush1.msra.mxu0 %v2290_v30  ;;  %887 = vmatpush1.msra.mxu1 %v2356_v41 }
 0x31f   :  { %817 = vmatprep.subr.mxu0 %v2302_v32  ;;  %888 = vmatprep.subr.mxu1 %v2368_v43 }
 0x320   :  { %818 = vmatpush1.msra.mxu0 %v2314_v34  ;;  %889 = vmatpush1.msra.mxu1 %v2380_v45  ;;  %v1728_v34 = vld [vmem:[%s3556_s0 + $0x70] sm:$0xff] }
 0x321   :  { %819 = vmatprep.subr.mxu0 %v2326_v36  ;;  %890 = vmatprep.subr.mxu1 %v2392_v47 }
 0x322   :  { %820 = vmatpush1.msra.mxu0 %v2338_v38  ;;  %891 = vmatpush1.msra.mxu1 %v2404_v49 }
 0x323   :  { %821 = vmatprep.subr.mxu0 %v2350_v40  ;;  %892 = vmatprep.subr.mxu1 %v2416_v51 }
 0x324   :  { %822 = vmatpush1.msra.mxu0 %v2362_v42  ;;  %893 = vmatpush1.msra.mxu1 %v3647_v44 }
 0x325   :  { %823 = vmatprep.subr.mxu0 %v3686_v1  ;;  %894 = vmatprep.subr.mxu1 %v3687_v2  ;;  %v2901_v1 = vld [vmem:[%s3555_s1 + $0x188] sm:$0xff] }
 0x326   :  { %824 = vmatpush1.msra.mxu0 %v3688_v4  ;;  %895 = vmatpush1.msra.mxu1 %v3689_v5  ;;  %v2907_v4 = vld [vmem:[%s3555_s1 + $0x198] sm:$0xff] }
 0x327   :  { %825 = vmatprep.subr.mxu0 %v3690_v6  ;;  %896 = vmatprep.subr.mxu1 %v3691_v7  ;;  %v2913_v6 = vld [vmem:[%s3555_s1 + $0x180] sm:$0xff] }
 0x328   :  { %826 = vmatpush1.msra.mxu0 %v3692_v8  ;;  %897 = vmatpush1.msra.mxu1 %v3693_v10  ;;  %v2919_v8 = vld [vmem:[%s3555_s1 + $0x190] sm:$0xff] }
 0x329   :  { %827 = vmatprep.subr.mxu0 %v3694_v11  ;;  %898 = vmatprep.subr.mxu1 %v3695_v12  ;;  %v2925_v11 = vld [vmem:[%s3555_s1 + $0x168] sm:$0xff] }
 0x32a   :  { %828 = vmatpush1.msra.mxu0 %v3696_v13  ;;  %899 = vmatpush1.msra.mxu1 %v3697_v14  ;;  %v2931_v13 = vld [vmem:[%s3555_s1 + $0x178] sm:$0xff] }
 0x32b   :  { %829 = vmatprep.subr.mxu0 %v3698_v15  ;;  %900 = vmatprep.subr.mxu1 %v3699_v16 }
 0x32c   :  { %830 = vmatpush1.msra.mxu0 %v3700_v17  ;;  %863 = vmatprep.mubr.f32.mxu0 %v3701_v18 }
 0x32d   :  { %901 = vmatpush1.msra.mxu1 %v3702_v19  ;;  %934 = vmatprep.mubr.f32.mxu1 %v3701_v18 }
 0x32e   :  { %974 = vmatprep.subr.mxu0 %v2818_v20  ;;  %1045 = vmatprep.subr.mxu1 %v3704_v21  ;;  %v2937_v21 = vld [vmem:[%s3555_s1 + $0x160] sm:$0xff] }
 0x3cd   :  { %v690_v23 = vpop.f32.mrf.mxu0  ;;  %v761_v29 = vpop.f32.mrf.mxu1 }
 0x3ce   :  { %v766_v25 = vadd.f32 %v1726_v22, %v690_v23  ;;  %v768_v37 = vadd.f32 %v1728_v34, %v761_v29  ;;  %v2943_v22 = vld [vmem:[%s3555_s1 + $0x170] sm:$0xff]  ;;  %v2949_v23 = vld [vmem:[%s3555_s1 + $0x148] sm:$0xff]  ;;  %v2985_v29 = vld [vmem:[%s3555_s1 + $0x120] sm:$0xff] }
 0x3cf   :  { %v692_v26 = vpop.f32.mrf.mxu0  ;;  %v763_v32 = vpop.f32.mrf.mxu1  ;;  %v3015_v34 = vld [vmem:[%s3555_s1 + $0x110] sm:$0xff] }
 0x3d0   :  { %v1730_v27 = vmul.f32 -1.442695, %v766_v25  ;;  %v767_v28 = vadd.f32 %v1727_v24, %v692_v26  ;;  %v769_v33 = vadd.f32 %v1729_v31, %v763_v32  ;;  %v2955_v24 = vld [vmem:[%s3555_s1 + $0x158] sm:$0xff]  ;;  %v2961_v25 = vld [vmem:[%s3555_s1 + $0x140] sm:$0xff]  ;;  %v2967_v26 = vld [vmem:[%s3555_s1 + $0x150] sm:$0xff] }
 0x3d1   :  { %v2997_v31 = vld [vmem:[%s3555_s1 + $0x108] sm:$0xff]  ;;  %v3003_v32 = vld [vmem:[%s3555_s1 + $0x118] sm:$0xff] }
 0x3d2   :  { %1919 = vpow2.f32 %v1730_v27  ;;  %v1731_v30 = vmul.f32 -1.442695, %v767_v28  ;;  %v1732_v35 = vmul.f32 -1.442695, %v769_v33  ;;  %v2973_v27 = vld [vmem:[%s3555_s1 + $0x128] sm:$0xff]  ;;  %v2979_v28 = vld [vmem:[%s3555_s1 + $0x138] sm:$0xff] }
 0x3d3   :  { %v3009_v33 = vld [vmem:[%s3555_s1 + $0x100] sm:$0xff] }
 0x3d4   :  { %1921 = vpow2.f32 %v1731_v30  ;;  %v2991_v30 = vld [vmem:[%s3555_s1 + $0x130] sm:$0xff] }
 0x3d5   :  { %1923 = vpow2.f32 %v1732_v35  ;;  %v3021_v35 = vld [vmem:[%s3555_s1 + $0xe8] sm:$0xff] }
 0x3df   :  { %v1920_v36 = vpop.eup %1919 }
 0x3e0   :  { %v773_v38 = vadd.f32 1.0, %v1920_v36  ;;  %v3027_v36 = vld [vmem:[%s3555_s1 + $0xf8] sm:$0xff] }
 0x3e1   :  { %v1922_v39 = vpop.eup %1921 }
 0x3e2   :  { %1925 = vrcp.f32 %v773_v38  ;;  %v779_v40 = vadd.f32 1.0, %v1922_v39  ;;  %v1924_v41 = vpop.eup %1923  ;;  %v3039_v38 = vld [vmem:[%s3555_s1 + $0xf0] sm:$0xff]  ;;  %v3045_v39 = vld [vmem:[%s3555_s1 + $0xc8] sm:$0xff] }
 0x3e3   :  { %1927 = vtanh.f32 %v768_v37  ;;  %v786_v55 = vadd.f32 1.0, %v1924_v41  ;;  %v3033_v37 = vld [vmem:[%s3555_s1 + $0xe0] sm:$0xff] }
 0x3e4   :  { %1929 = vrcp.f32 %v779_v40  ;;  %v3051_v40 = vld [vmem:[%s3555_s1 + $0xd8] sm:$0xff]  ;;  %v3057_v41 = vld [vmem:[%s3555_s1 + $0xc0] sm:$0xff] }
 0x3e5   :  { %1931 = vrcp.f32 %v786_v55 }
 0x3ef   :  { %v1926_v42 = vpop.eup %1925 }
 0x3f0   :  { %v1928_v43 = vpop.eup %1927 }
 0x3f1   :  { %v1930_v46 = vpop.eup %1929  ;;  %v790_v61 = vmul.f32 %v1928_v43, %v1926_v42  ;;  %v3064_v42 = vld [vmem:[%s3555_s1 + $0xa8] sm:$0xff]  ;;  %v3071_v43 = vld [vmem:[%s3555_s1 + $0xa0] sm:$0xff] }
 0x3f2   :  { %v789_v58 = vmul.f32 %v1930_v46, %v2748_v53  ;;  %v1932_v9 = vpop.eup %1931  ;;  %v2847_v53 = vld [vmem:[%s3555_s1 + $0x1f0] sm:$0xff] }
 0x3f4   :  { %v2835_v63 = vadd.f32 %v790_v61, %v789_v58  ;;  %v1736_v58 = vld [vmem:[%s3556_s0 + $0x98] sm:$0xff] }
 0x3f6   :  { %1933 = vtanh.f32 %v2835_v63 }
 0x403   :  { %v1934_v57 = vpop.eup %1933 }
 0x404   :  { %v793_v62 = vmul.f32 %v1934_v57, %v1932_v9 }
 0x406   :  { %864 = vmatmul.mubr.f32.vlgmr.msra.gmra.mxu0 %v793_v62  ;;  %935 = vmatmul.mubr.f32.vlgmr.msra.gmra.mxu1 %v793_v62  ;;  %v1735_v62 = vld [vmem:[%s3556_s0 + $0x90] sm:$0xff] }
 0x407   :  { %975 = vmatpush1.msra.mxu0 %v2841_v0  ;;  %1046 = vmatpush1.msra.mxu1 %v2847_v53 }
 0x408   :  { %976 = vmatprep.subr.mxu0 %v2853_v56  ;;  %1047 = vmatprep.subr.mxu1 %v2859_v3 }
 0x409   :  { %977 = vmatpush1.msra.mxu0 %v2865_v59  ;;  %1048 = vmatpush1.msra.mxu1 %v2871_v54 }
 0x40a   :  { %978 = vmatprep.subr.mxu0 %v2877_v52  ;;  %1049 = vmatprep.subr.mxu1 %v2883_v60 }
 0x40b   :  { %979 = vmatpush1.msra.mxu0 %v2889_v48  ;;  %1050 = vmatpush1.msra.mxu1 %v2895_v50 }
 0x40c   :  { %980 = vmatprep.subr.mxu0 %v2901_v1  ;;  %1051 = vmatprep.subr.mxu1 %v2907_v4 }
 0x40d   :  { %981 = vmatpush1.msra.mxu0 %v2913_v6  ;;  %1052 = vmatpush1.msra.mxu1 %v2919_v8 }
 0x40e   :  { %982 = vmatprep.subr.mxu0 %v2925_v11  ;;  %1053 = vmatprep.subr.mxu1 %v2931_v13 }
 0x40f   :  { %983 = vmatpush1.msra.mxu0 %v2937_v21  ;;  %1054 = vmatpush1.msra.mxu1 %v2943_v22 }
 0x410   :  { %984 = vmatprep.subr.mxu0 %v2949_v23  ;;  %1055 = vmatprep.subr.mxu1 %v2955_v24 }
 0x411   :  { %985 = vmatpush1.msra.mxu0 %v2961_v25  ;;  %1056 = vmatpush1.msra.mxu1 %v2967_v26 }
 0x412   :  { %986 = vmatprep.subr.mxu0 %v2973_v27  ;;  %1057 = vmatprep.subr.mxu1 %v2979_v28 }
 0x413   :  { %987 = vmatpush1.msra.mxu0 %v2985_v29  ;;  %1058 = vmatpush1.msra.mxu1 %v2991_v30 }
 0x414   :  { %988 = vmatprep.subr.mxu0 %v2997_v31  ;;  %1059 = vmatprep.subr.mxu1 %v3003_v32 }
 0x415   :  { %989 = vmatpush1.msra.mxu0 %v3009_v33  ;;  %1060 = vmatpush1.msra.mxu1 %v3015_v34 }
 0x416   :  { %990 = vmatprep.subr.mxu0 %v3021_v35  ;;  %1061 = vmatprep.subr.mxu1 %v3027_v36 }
 0x417   :  { %991 = vmatpush1.msra.mxu0 %v3033_v37  ;;  %1062 = vmatpush1.msra.mxu1 %v3039_v38 }
 0x418   :  { %992 = vmatprep.subr.mxu0 %v3045_v39  ;;  %1063 = vmatprep.subr.mxu1 %v3051_v40 }
 0x419   :  { %993 = vmatpush1.msra.mxu0 %v3057_v41  ;;  %1064 = vmatpush1.msra.mxu1 %v2380_v45  ;;  %v3078_v45 = vld [vmem:[%s3555_s1 + $0x88] sm:$0xff] }
 0x41a   :  { %994 = vmatprep.subr.mxu0 %v3064_v42  ;;  %1065 = vmatprep.subr.mxu1 %v2392_v47  ;;  %v3085_v47 = vld [vmem:[%s3555_s1 + $0x80] sm:$0xff] }
 0x41b   :  { %995 = vmatpush1.msra.mxu0 %v3071_v43  ;;  %1066 = vmatpush1.msra.mxu1 %v2404_v49  ;;  %v3092_v49 = vld [vmem:[%s3555_s1 + $0x68] sm:$0xff] }
 0x41c   :  { %996 = vmatprep.subr.mxu0 %v3078_v45  ;;  %1067 = vmatprep.subr.mxu1 %v2416_v51  ;;  %3705 = vst [vmem:[#allocation4_spill] sm:$0xff] %v3092_v49  ;;  %v3099_v51 = vld [vmem:[%s3555_s1 + $0x60] sm:$0xff] }
 0x41d   :  { %997 = vmatpush1.msra.mxu0 %v3085_v47  ;;  %1068 = vmatpush1.msra.mxu1 %v3647_v44  ;;  %3706 = vst [vmem:[#allocation6_spill] sm:$0xff] %v3099_v51  ;;  %v3106_v44 = vld [vmem:[%s3555_s1 + $0x48] sm:$0xff] }
 0x41e   :  { %998 = vmatprep.subr.mxu0 %v3092_v49  ;;  %1069 = vmatprep.subr.mxu1 %v3687_v2  ;;  %3707 = vst [vmem:[#allocation13_spill] sm:$0xff] %v3106_v44  ;;  %v3113_v2 = vld [vmem:[%s3555_s1 + $0x40] sm:$0xff] }
 0x41f   :  { %999 = vmatpush1.msra.mxu0 %v3099_v51  ;;  %1070 = vmatpush1.msra.mxu1 %v3689_v5  ;;  %3708 = vst [vmem:[#allocation7_spill] sm:$0xff] %v3113_v2  ;;  %v3120_v5 = vld [vmem:[%s3555_s1 + $0x28] sm:$0xff] }
 0x420   :  { %1000 = vmatprep.subr.mxu0 %v3106_v44  ;;  %1071 = vmatprep.subr.mxu1 %v3691_v7  ;;  %3709 = vst [vmem:[#allocation15_spill] sm:$0xff] %v3120_v5  ;;  %v3127_v7 = vld [vmem:[%s3555_s1 + $0x20] sm:$0xff] }
 0x421   :  { %1001 = vmatpush1.msra.mxu0 %v3113_v2  ;;  %1072 = vmatpush1.msra.mxu1 %v3693_v10  ;;  %3710 = vst [vmem:[#allocation8_spill] sm:$0xff] %v3127_v7  ;;  %v3141_v10 = vld [vmem:[%s3555_s1 + $0x1f8] sm:$0xff] }
 0x422   :  { %1002 = vmatprep.subr.mxu0 %v3120_v5  ;;  %1073 = vmatprep.subr.mxu1 %v3695_v12  ;;  %3711 = vst [vmem:[#allocation17_spill] sm:$0xff] %v3141_v10  ;;  %v1733_v12 = vld [vmem:[%s3556_s0 + $0x80] sm:$0xff] }
 0x423   :  { %1003 = vmatpush1.msra.mxu0 %v3127_v7  ;;  %1074 = vmatpush1.msra.mxu1 %v3697_v14 }
 0x424   :  { %1004 = vmatprep.subr.mxu0 %v3698_v15  ;;  %1075 = vmatprep.subr.mxu1 %v3699_v16  ;;  %v1734_v15 = vld [vmem:[%s3556_s0 + $0x88] sm:$0xff] }
 0x425   :  { %1005 = vmatpush1.msra.mxu0 %v3700_v17  ;;  %1038 = vmatprep.mubr.f32.mxu0 %v3701_v18 }
 0x426   :  { %1076 = vmatpush1.msra.mxu1 %v3702_v19  ;;  %1109 = vmatprep.mubr.f32.mxu1 %v3701_v18 }
 0x427   :  { %1149 = vmatprep.subr.mxu0 %v2818_v20  ;;  %1220 = vmatprep.subr.mxu1 %v3141_v10 }
 0x4c6   :  { %v865_v14 = vpop.f32.mrf.mxu0  ;;  %v936_v55 = vpop.f32.mrf.mxu1 }
 0x4c7   :  { %v941_v16 = vadd.f32 %v1733_v12, %v865_v14  ;;  %v943_v12 = vadd.f32 %v1735_v62, %v936_v55  ;;  %v3221_v62 = vld [vmem:[%s3555_s1 + $0x98] sm:$0xff] }
 0x4c8   :  { %v867_v17 = vpop.f32.mrf.mxu0  ;;  %v938_v9 = vpop.f32.mrf.mxu1 }
 0x4c9   :  { %v1737_v19 = vmul.f32 -1.442695, %v941_v16  ;;  %v942_v46 = vadd.f32 %v1734_v15, %v867_v17  ;;  %v944_v57 = vadd.f32 %v1736_v58, %v938_v9 }
 0x4cb   :  { %1935 = vpow2.f32 %v1737_v19  ;;  %v1738_v61 = vmul.f32 -1.442695, %v942_v46  ;;  %v1739_v10 = vmul.f32 -1.442695, %v944_v57  ;;  %v3214_v57 = vld [vmem:[%s3555_s1 + $0xb0] sm:$0xff] }
 0x4cd   :  { %1937 = vpow2.f32 %v1738_v61 }
 0x4ce   :  { %1939 = vpow2.f32 %v1739_v10 }
 0x4d8   :  { %v1936_v20 = vpop.eup %1935 }
 0x4d9   :  { %v948_v14 = vadd.f32 1.0, %v1936_v20 }
 0x4da   :  { %v1938_v16 = vpop.eup %1937 }
 0x4db   :  { %1941 = vrcp.f32 %v948_v14  ;;  %v954_v15 = vadd.f32 1.0, %v1938_v16  ;;  %v1940_v17 = vpop.eup %1939  ;;  %v3235_v14 = vld [vmem:[%s3555_s1 + $0x78] sm:$0xff]  ;;  %v3242_v16 = vld [vmem:[%s3555_s1 + $0x70] sm:$0xff] }
 0x4dc   :  { %1943 = vtanh.f32 %v943_v12  ;;  %v961_v18 = vadd.f32 1.0, %v1940_v17  ;;  %v3228_v12 = vld [vmem:[%s3555_s1 + $0x90] sm:$0xff]  ;;  %3712 = vst [vmem:[#allocation9_spill] sm:$0xff] %v3235_v14  ;;  %3713 = vst [vmem:[#allocation18_spill] sm:$0xff] %v3242_v16 }
 0x4dd   :  { %1945 = vrcp.f32 %v954_v15  ;;  %v3249_v15 = vld [vmem:[%s3555_s1 + $0x58] sm:$0xff]  ;;  %v3256_v17 = vld [vmem:[%s3555_s1 + $0x50] sm:$0xff] }
 0x4de   :  { %1947 = vrcp.f32 %v961_v18  ;;  %v3200_v18 = vld [vmem:[%s3555_s1 + $0xd0] sm:$0xff]  ;;  %3714 = vst [vmem:[#allocation10_spill] sm:$0xff] %v3249_v15  ;;  %3715 = vst [vmem:[#allocation19_spill] sm:$0xff] %v3256_v17 }
 0x4e8   :  { %v1942_v19 = vpop.eup %1941 }
 0x4e9   :  { %v1944_v46 = vpop.eup %1943 }
 0x4ea   :  { %v1946_v61 = vpop.eup %1945  ;;  %v965_v58 = vmul.f32 %v1944_v46, %v1942_v19  ;;  %v3263_v19 = vld [vmem:[%s3555_s1 + $0x38] sm:$0xff]  ;;  %v3717_v46 = vld [vmem:[#allocation8_spill] sm:$0xff] }
 0x4eb   :  { %v964_v9 = vmul.f32 %v1946_v61, %v2835_v63  ;;  %v1948_v20 = vpop.eup %1947  ;;  %v3207_v63 = vld [vmem:[%s3555_s1 + $0xb8] sm:$0xff]  ;;  %3716 = vst [vmem:[#allocation12_spill] sm:$0xff] %v3263_v19  ;;  %v3270_v61 = vld [vmem:[%s3555_s1 + $0x30] sm:$0xff] }
 0x4ec   :  { %3718 = vst [vmem:[#allocation20_spill] sm:$0xff] %v3270_v61 }
 0x4ed   :  { %v3157_v7 = vadd.f32 %v965_v58, %v964_v9  ;;  %v3276_v58 = vld [vmem:[%s3555_s1 + $0x8] sm:$0xff]  ;;  %v3282_v9 = vld [vmem:[%s3555_s1 + $0x18] sm:$0xff] }
 0x4ee   :  { %3719 = vst [vmem:[#allocation14_spill] sm:$0xff] %v3276_v58  ;;  %3720 = vst [vmem:[#allocation21_spill] sm:$0xff] %v3282_v9 }
 0x4ef   :  { %1949 = vtanh.f32 %v3157_v7 }
 0x4fc   :  { %v1950_v55 = vpop.eup %1949 }
 0x4fd   :  { %v968_v10 = vmul.f32 %v1950_v55, %v1948_v20  ;;  %v3288_v20 = vld [vmem:[%s3555_s1] sm:$0xff]  ;;  %v3722_v55 = vmov 0.0  }
 0x4fe   :  { %3721 = vst [vmem:[#allocation16_spill] sm:$0xff] %v3288_v20 }
 0x4ff   :  { %1039 = vmatmul.mubr.f32.vlgmr.msra.gmra.mxu0 %v968_v10  ;;  %1110 = vmatmul.mubr.f32.vlgmr.msra.gmra.mxu1 %v968_v10  ;;  %v3295_v10 = vld [vmem:[%s3555_s1 + $0x10] sm:$0xff] }
 0x500   :  { %1150 = vmatpush1.msra.mxu0 %v2841_v0  ;;  %1221 = vmatpush1.msra.mxu1 %v2847_v53  ;;  %3723 = vst [vmem:[#allocation22_spill] sm:$0xff] %v3295_v10 }
 0x501   :  { %1151 = vmatprep.subr.mxu0 %v2853_v56  ;;  %1222 = vmatprep.subr.mxu1 %v2859_v3 }
 0x502   :  { %1152 = vmatpush1.msra.mxu0 %v2865_v59  ;;  %1223 = vmatpush1.msra.mxu1 %v2871_v54 }
 0x503   :  { %1153 = vmatprep.subr.mxu0 %v2877_v52  ;;  %1224 = vmatprep.subr.mxu1 %v2883_v60 }
 0x504   :  { %1154 = vmatpush1.msra.mxu0 %v2889_v48  ;;  %1225 = vmatpush1.msra.mxu1 %v2895_v50 }
 0x505   :  { %1155 = vmatprep.subr.mxu0 %v2901_v1  ;;  %1226 = vmatprep.subr.mxu1 %v2907_v4 }
 0x506   :  { %1156 = vmatpush1.msra.mxu0 %v2913_v6  ;;  %1227 = vmatpush1.msra.mxu1 %v2919_v8 }
 0x507   :  { %1157 = vmatprep.subr.mxu0 %v2925_v11  ;;  %1228 = vmatprep.subr.mxu1 %v2931_v13 }
 0x508   :  { %1158 = vmatpush1.msra.mxu0 %v2937_v21  ;;  %1229 = vmatpush1.msra.mxu1 %v2943_v22 }
 0x509   :  { %1159 = vmatprep.subr.mxu0 %v2949_v23  ;;  %1230 = vmatprep.subr.mxu1 %v2955_v24 }
 0x50a   :  { %1160 = vmatpush1.msra.mxu0 %v2961_v25  ;;  %1231 = vmatpush1.msra.mxu1 %v2967_v26 }
 0x50b   :  { %1161 = vmatprep.subr.mxu0 %v2973_v27  ;;  %1232 = vmatprep.subr.mxu1 %v2979_v28 }
 0x50c   :  { %1162 = vmatpush1.msra.mxu0 %v2985_v29  ;;  %1233 = vmatpush1.msra.mxu1 %v2991_v30 }
 0x50d   :  { %1163 = vmatprep.subr.mxu0 %v2997_v31  ;;  %1234 = vmatprep.subr.mxu1 %v3003_v32 }
 0x50e   :  { %1164 = vmatpush1.msra.mxu0 %v3009_v33  ;;  %1235 = vmatpush1.msra.mxu1 %v3015_v34 }
 0x50f   :  { %1165 = vmatprep.subr.mxu0 %v3021_v35  ;;  %1236 = vmatprep.subr.mxu1 %v3027_v36 }
 0x510   :  { %1166 = vmatpush1.msra.mxu0 %v3033_v37  ;;  %1237 = vmatpush1.msra.mxu1 %v3039_v38 }
 0x511   :  { %1167 = vmatprep.subr.mxu0 %v3045_v39  ;;  %1238 = vmatprep.subr.mxu1 %v3051_v40 }
 0x512   :  { %1168 = vmatpush1.msra.mxu0 %v3057_v41  ;;  %1239 = vmatpush1.msra.mxu1 %v3200_v18 }
 0x513   :  { %1169 = vmatprep.subr.mxu0 %v3064_v42  ;;  %1240 = vmatprep.subr.mxu1 %v3207_v63 }
 0x514   :  { %1170 = vmatpush1.msra.mxu0 %v3071_v43  ;;  %1241 = vmatpush1.msra.mxu1 %v3214_v57 }
 0x515   :  { %1171 = vmatprep.subr.mxu0 %v3078_v45  ;;  %1242 = vmatprep.subr.mxu1 %v3221_v62 }
 0x516   :  { %1172 = vmatpush1.msra.mxu0 %v3085_v47  ;;  %1243 = vmatpush1.msra.mxu1 %v3228_v12 }
 0x517   :  { %1173 = vmatprep.subr.mxu0 %v3092_v49  ;;  %1244 = vmatprep.subr.mxu1 %v3235_v14 }
 0x518   :  { %1174 = vmatpush1.msra.mxu0 %v3099_v51  ;;  %1245 = vmatpush1.msra.mxu1 %v3242_v16 }
 0x519   :  { %1175 = vmatprep.subr.mxu0 %v3106_v44  ;;  %1246 = vmatprep.subr.mxu1 %v3249_v15  ;;  %v1742_v44 = vld [vmem:[%s3556_s0 + $0xb0] sm:$0xff] }
 0x51a   :  { %1176 = vmatpush1.msra.mxu0 %v3113_v2  ;;  %1247 = vmatpush1.msra.mxu1 %v3256_v17 }
 0x51b   :  { %1177 = vmatprep.subr.mxu0 %v3120_v5  ;;  %1248 = vmatprep.subr.mxu1 %v3263_v19 }
 0x51c   :  { %1178 = vmatpush1.msra.mxu0 %v3717_v46  ;;  %1249 = vmatpush1.msra.mxu1 %v3270_v61  ;;  %v1740_v61 = vld [vmem:[%s3556_s0 + $0xa0] sm:$0xff]  ;;  %v1741_v46 = vld [vmem:[%s3556_s0 + $0xa8] sm:$0xff] }
 0x51d   :  { %1179 = vmatprep.subr.mxu0 %v3276_v58  ;;  %1250 = vmatprep.subr.mxu1 %v3282_v9  ;;  %v3724_v58 = vld [vmem:[#allocation11_spill] sm:$0xff]  ;;  %v3725_v9 = vld [vmem:[#allocation17_spill] sm:$0xff] }
 0x51e   :  { %1180 = vmatpush1.msra.mxu0 %v3288_v20  ;;  %1213 = vmatprep.mubr.f32.mxu0 %v3722_v55 }
 0x51f   :  { %1251 = vmatpush1.msra.mxu1 %v3295_v10  ;;  %1284 = vmatprep.mubr.f32.mxu1 %v3722_v55 }
 0x520   :  { %1324 = vmatprep.subr.mxu0 %v3724_v58  ;;  %1395 = vmatprep.subr.mxu1 %v3725_v9  ;;  %v1743_v58 = vld [vmem:[%s3556_s0 + $0xb8] sm:$0xff] }
 0x5bf   :  { %v1040_v20 = vpop.f32.mrf.mxu0  ;;  %v1111_v10 = vpop.f32.mrf.mxu1 }
 0x5c0   :  { %v1116_v19 = vadd.f32 %v1740_v61, %v1040_v20  ;;  %v1118_v61 = vadd.f32 %v1742_v44, %v1111_v10 }
 0x5c1   :  { %v1042_v5 = vpop.f32.mrf.mxu0  ;;  %v1113_v9 = vpop.f32.mrf.mxu1 }
 0x5c2   :  { %v1744_v17 = vmul.f32 -1.442695, %v1116_v19  ;;  %v1117_v2 = vadd.f32 %v1741_v46, %v1042_v5  ;;  %v1119_v15 = vadd.f32 %v1743_v58, %v1113_v9 }
 0x5c4   :  { %1951 = vpow2.f32 %v1744_v17  ;;  %v1745_v55 = vmul.f32 -1.442695, %v1117_v2  ;;  %v1746_v16 = vmul.f32 -1.442695, %v1119_v15 }
 0x5c6   :  { %1953 = vpow2.f32 %v1745_v55 }
 0x5c7   :  { %1955 = vpow2.f32 %v1746_v16 }
 0x5d1   :  { %v1952_v51 = vpop.eup %1951 }
 0x5d2   :  { %v1123_v20 = vadd.f32 1.0, %v1952_v51 }
 0x5d3   :  { %v1954_v19 = vpop.eup %1953 }
 0x5d4   :  { %1957 = vrcp.f32 %v1123_v20  ;;  %v1129_v5 = vadd.f32 1.0, %v1954_v19  ;;  %v1956_v2 = vpop.eup %1955  ;;  %v1500_v19 = vld [vmem:[%s3557_s2 + $0x10] sm:$0xff] }
 0x5d5   :  { %1959 = vtanh.f32 %v1118_v61  ;;  %v1136_v14 = vadd.f32 1.0, %v1956_v2  ;;  %v1548_v2 = vld [vmem:[%s3558_s4 + $0x70] sm:$0xff] }
 0x5d6   :  { %1961 = vrcp.f32 %v1129_v5  ;;  %v1549_v5 = vld [vmem:[%s3558_s4 + $0x78] sm:$0xff] }
 0x5d7   :  { %1963 = vrcp.f32 %v1136_v14  ;;  %v1499_v14 = vld [vmem:[%s3557_s2] sm:$0xff] }
 0x5d8   :  { %v1761_v15 = vmul.f32 -1.442695, %v1499_v14 }
 0x5e1   :  { %v1958_v17 = vpop.eup %1957 }
 0x5e2   :  { %v1960_v46 = vpop.eup %1959 }
 0x5e3   :  { %v1962_v55 = vpop.eup %1961  ;;  %v1140_v58 = vmul.f32 %v1960_v46, %v1958_v17  ;;  %v1533_v17 = vld [vmem:[%s3559_s3 + $0x78] sm:$0xff]  ;;  %v1547_v46 = vld [vmem:[%s3558_s4 + $0x68] sm:$0xff] }
 0x5e4   :  { %v1139_v9 = vmul.f32 %v1962_v55, %v3157_v7  ;;  %v1964_v51 = vpop.eup %1963  ;;  %v1532_v55 = vld [vmem:[%s3559_s3 + $0x70] sm:$0xff] }
 0x5e6   :  { %v3314_v49 = vadd.f32 %v1140_v58, %v1139_v9  ;;  %v1546_v58 = vld [vmem:[%s3558_s4 + $0x60] sm:$0xff]  ;;  %v1531_v9 = vld [vmem:[%s3559_s3 + $0x68] sm:$0xff] }
 0x5e8   :  { %1965 = vtanh.f32 %v3314_v49 }
 0x5f5   :  { %v1966_v44 = vpop.eup %1965 }
 0x5f6   :  { %v1143_v16 = vmul.f32 %v1966_v44, %v1964_v51  ;;  %v1545_v51 = vld [vmem:[%s3558_s4 + $0x58] sm:$0xff]  ;;  %v1530_v44 = vld [vmem:[%s3559_s3 + $0x60] sm:$0xff] }
 0x5f8   :  { %1214 = vmatmul.mubr.f32.vlgmr.msra.gmra.mxu0 %v1143_v16  ;;  %1285 = vmatmul.mubr.f32.vlgmr.msra.gmra.mxu1 %v1143_v16  ;;  %v1544_v16 = vld [vmem:[%s3558_s4 + $0x50] sm:$0xff] }
 0x5f9   :  { %1325 = vmatpush1.msra.mxu0 %v2841_v0  ;;  %1396 = vmatpush1.msra.mxu1 %v2847_v53  ;;  %v3726_v0 = vld [vmem:[#allocation4_spill] sm:$0xff]  ;;  %v3727_v53 = vld [vmem:[#allocation9_spill] sm:$0xff] }
 0x5fa   :  { %1326 = vmatprep.subr.mxu0 %v2853_v56  ;;  %1397 = vmatprep.subr.mxu1 %v2859_v3  ;;  %v3728_v56 = vld [vmem:[#allocation6_spill] sm:$0xff] }
 0x5fb   :  { %1327 = vmatpush1.msra.mxu0 %v2865_v59  ;;  %1398 = vmatpush1.msra.mxu1 %v2871_v54  ;;  %v3729_v3 = vld [vmem:[#allocation18_spill] sm:$0xff]  ;;  %v3730_v59 = vld [vmem:[#allocation13_spill] sm:$0xff] }
 0x5fc   :  { %1328 = vmatprep.subr.mxu0 %v2877_v52  ;;  %1399 = vmatprep.subr.mxu1 %v2883_v60  ;;  %v3731_v54 = vld [vmem:[#allocation10_spill] sm:$0xff]  ;;  %v3732_v52 = vld [vmem:[#allocation7_spill] sm:$0xff] }
 0x5fd   :  { %1329 = vmatpush1.msra.mxu0 %v2889_v48  ;;  %1400 = vmatpush1.msra.mxu1 %v2895_v50  ;;  %v3733_v60 = vld [vmem:[#allocation19_spill] sm:$0xff]  ;;  %v3735_v50 = vld [vmem:[#allocation12_spill] sm:$0xff] }
 0x5fe   :  { %1330 = vmatprep.subr.mxu0 %v2901_v1  ;;  %1401 = vmatprep.subr.mxu1 %v2907_v4  ;;  %v3734_v48 = vld [vmem:[#allocation15_spill] sm:$0xff]  ;;  %v3736_v1 = vld [vmem:[#allocation8_spill] sm:$0xff] }
 0x5ff   :  { %1331 = vmatpush1.msra.mxu0 %v2913_v6  ;;  %1402 = vmatpush1.msra.mxu1 %v2919_v8  ;;  %v3737_v4 = vld [vmem:[#allocation20_spill] sm:$0xff]  ;;  %v3738_v6 = vld [vmem:[#allocation14_spill] sm:$0xff]  ;;  %v3739_v8 = vld [vmem:[#allocation21_spill] sm:$0xff] }
 0x600   :  { %1332 = vmatprep.subr.mxu0 %v2925_v11  ;;  %1403 = vmatprep.subr.mxu1 %v2931_v13  ;;  %v3740_v11 = vld [vmem:[#allocation16_spill] sm:$0xff]  ;;  %v3741_v13 = vmov 0.0  }
 0x601   :  { %1333 = vmatpush1.msra.mxu0 %v2937_v21  ;;  %1404 = vmatpush1.msra.mxu1 %v2943_v22  ;;  %v3742_v21 = vld [vmem:[#allocation22_spill] sm:$0xff]  ;;  %v1747_v22 = vld [vmem:[%s3556_s0 + $0xc0] sm:$0xff] }
 0x602   :  { %1334 = vmatprep.subr.mxu0 %v2949_v23  ;;  %1405 = vmatprep.subr.mxu1 %v2955_v24  ;;  %v1748_v24 = vld [vmem:[%s3556_s0 + $0xc8] sm:$0xff] }
 0x603   :  { %1335 = vmatpush1.msra.mxu0 %v2961_v25  ;;  %1406 = vmatpush1.msra.mxu1 %v2967_v26 }
 0x604   :  { %1336 = vmatprep.subr.mxu0 %v2973_v27  ;;  %1407 = vmatprep.subr.mxu1 %v2979_v28 }
 0x605   :  { %1337 = vmatpush1.msra.mxu0 %v2985_v29  ;;  %1408 = vmatpush1.msra.mxu1 %v2991_v30 }
 0x606   :  { %1338 = vmatprep.subr.mxu0 %v2997_v31  ;;  %1409 = vmatprep.subr.mxu1 %v3003_v32  ;;  %v1750_v31 = vld [vmem:[%s3556_s0 + $0xd8] sm:$0xff] }
 0x607   :  { %1339 = vmatpush1.msra.mxu0 %v3009_v33  ;;  %1410 = vmatpush1.msra.mxu1 %v3015_v34  ;;  %v1749_v34 = vld [vmem:[%s3556_s0 + $0xd0] sm:$0xff] }
 0x608   :  { %1340 = vmatprep.subr.mxu0 %v3021_v35  ;;  %1411 = vmatprep.subr.mxu1 %v3027_v36 }
 0x609   :  { %1341 = vmatpush1.msra.mxu0 %v3033_v37  ;;  %1412 = vmatpush1.msra.mxu1 %v3039_v38 }
 0x60a   :  { %1342 = vmatprep.subr.mxu0 %v3045_v39  ;;  %1413 = vmatprep.subr.mxu1 %v3051_v40 }
 0x60b   :  { %1343 = vmatpush1.msra.mxu0 %v3057_v41  ;;  %1414 = vmatpush1.msra.mxu1 %v3200_v18 }
 0x60c   :  { %1344 = vmatprep.subr.mxu0 %v3064_v42  ;;  %1415 = vmatprep.subr.mxu1 %v3207_v63 }
 0x60d   :  { %1345 = vmatpush1.msra.mxu0 %v3071_v43  ;;  %1416 = vmatpush1.msra.mxu1 %v3214_v57 }
 0x60e   :  { %1346 = vmatprep.subr.mxu0 %v3078_v45  ;;  %1417 = vmatprep.subr.mxu1 %v3221_v62 }
 0x60f   :  { %1347 = vmatpush1.msra.mxu0 %v3085_v47  ;;  %1418 = vmatpush1.msra.mxu1 %v3228_v12 }
 0x610   :  { %1348 = vmatprep.subr.mxu0 %v3726_v0  ;;  %1419 = vmatprep.subr.mxu1 %v3727_v53  ;;  %v1529_v0 = vld [vmem:[%s3559_s3 + $0x58] sm:$0xff]  ;;  %v1543_v53 = vld [vmem:[%s3558_s4 + $0x48] sm:$0xff] }
 0x611   :  { %1349 = vmatpush1.msra.mxu0 %v3728_v56  ;;  %1420 = vmatpush1.msra.mxu1 %v3729_v3  ;;  %v1528_v56 = vld [vmem:[%s3559_s3 + $0x50] sm:$0xff] }
 0x612   :  { %1350 = vmatprep.subr.mxu0 %v3730_v59  ;;  %1421 = vmatprep.subr.mxu1 %v3731_v54  ;;  %v1542_v54 = vld [vmem:[%s3558_s4 + $0x40] sm:$0xff] }
 0x613   :  { %1351 = vmatpush1.msra.mxu0 %v3732_v52  ;;  %1422 = vmatpush1.msra.mxu1 %v3733_v60  ;;  %v1527_v52 = vld [vmem:[%s3559_s3 + $0x48] sm:$0xff] }
 0x614   :  { %1352 = vmatprep.subr.mxu0 %v3734_v48  ;;  %1423 = vmatprep.subr.mxu1 %v3735_v50  ;;  %v1541_v48 = vld [vmem:[%s3558_s4 + $0x38] sm:$0xff]  ;;  %v1526_v50 = vld [vmem:[%s3559_s3 + $0x40] sm:$0xff] }
 0x615   :  { %1353 = vmatpush1.msra.mxu0 %v3736_v1  ;;  %1424 = vmatpush1.msra.mxu1 %v3737_v4  ;;  %v1540_v4 = vld [vmem:[%s3558_s4 + $0x30] sm:$0xff] }
 0x616   :  { %1354 = vmatprep.subr.mxu0 %v3738_v6  ;;  %1425 = vmatprep.subr.mxu1 %v3739_v8  ;;  %v1525_v6 = vld [vmem:[%s3559_s3 + $0x38] sm:$0xff] }
 0x617   :  { %1355 = vmatpush1.msra.mxu0 %v3740_v11  ;;  %1388 = vmatprep.mubr.f32.mxu0 %v3741_v13  ;;  %v1539_v11 = vld [vmem:[%s3558_s4 + $0x28] sm:$0xff] }
 0x618   :  { %1426 = vmatpush1.msra.mxu1 %v3742_v21  ;;  %1459 = vmatprep.mubr.f32.mxu1 %v3741_v13  ;;  %v1524_v21 = vld [vmem:[%s3559_s3 + $0x30] sm:$0xff] }
 0x619   :  { %1799 = vmatprep.subr.mxu0 %v3741_v13  ;;  %1834 = vmatprep.subr.mxu1 %v3741_v13 }
 0x6b8   :  { %v1215_v23 = vpop.f32.mrf.mxu0  ;;  %v1286_v29 = vpop.f32.mrf.mxu1 }
 0x6b9   :  { %v1291_v25 = vadd.f32 %v1747_v22, %v1215_v23  ;;  %v1293_v37 = vadd.f32 %v1749_v34, %v1286_v29  ;;  %v1538_v22 = vld [vmem:[%s3558_s4 + $0x20] sm:$0xff]  ;;  %v1523_v23 = vld [vmem:[%s3559_s3 + $0x28] sm:$0xff]  ;;  %v1520_v29 = vld [vmem:[%s3559_s3 + $0x10] sm:$0xff] }
 0x6ba   :  { %v1217_v26 = vpop.f32.mrf.mxu0  ;;  %v1288_v32 = vpop.f32.mrf.mxu1  ;;  %v1518_v34 = vld [vmem:[%s3559_s3] sm:$0xff] }
 0x6bb   :  { %v1751_v27 = vmul.f32 -1.442695, %v1291_v25  ;;  %v1292_v28 = vadd.f32 %v1748_v24, %v1217_v26  ;;  %v1294_v33 = vadd.f32 %v1750_v31, %v1288_v32  ;;  %v1537_v24 = vld [vmem:[%s3558_s4 + $0x18] sm:$0xff]  ;;  %v1522_v25 = vld [vmem:[%s3559_s3 + $0x20] sm:$0xff]  ;;  %v1536_v26 = vld [vmem:[%s3558_s4 + $0x10] sm:$0xff] }
 0x6bc   :  { %v1519_v31 = vld [vmem:[%s3559_s3 + $0x8] sm:$0xff] }
 0x6bd   :  { %1967 = vpow2.f32 %v1751_v27  ;;  %v1752_v30 = vmul.f32 -1.442695, %v1292_v28  ;;  %v1753_v35 = vmul.f32 -1.442695, %v1294_v33  ;;  %v1521_v27 = vld [vmem:[%s3559_s3 + $0x18] sm:$0xff]  ;;  %v1535_v28 = vld [vmem:[%s3558_s4 + $0x8] sm:$0xff] }
 0x6bf   :  { %1969 = vpow2.f32 %v1752_v30  ;;  %v1534_v30 = vld [vmem:[%s3558_s4] sm:$0xff] }
 0x6c0   :  { %1971 = vpow2.f32 %v1753_v35 }
 0x6ca   :  { %v1968_v36 = vpop.eup %1967 }
 0x6cb   :  { %v1298_v38 = vadd.f32 1.0, %v1968_v36  ;;  %v1754_v36 = vld [vmem:[%s3556_s0 + $0xe0] sm:$0xff] }
 0x6cc   :  { %v1970_v39 = vpop.eup %1969 }
 0x6cd   :  { %1973 = vrcp.f32 %v1298_v38  ;;  %v1304_v40 = vadd.f32 1.0, %v1970_v39  ;;  %v1972_v41 = vpop.eup %1971  ;;  %v1755_v38 = vld [vmem:[%s3556_s0 + $0xe8] sm:$0xff] }
 0x6ce   :  { %1975 = vtanh.f32 %v1293_v37  ;;  %v1311_v47 = vadd.f32 1.0, %v1972_v41 }
 0x6cf   :  { %1977 = vrcp.f32 %v1304_v40 }
 0x6d0   :  { %1979 = vrcp.f32 %v1311_v47 }
 0x6da   :  { %v1974_v42 = vpop.eup %1973 }
 0x6db   :  { %v1976_v43 = vpop.eup %1975 }
 0x6dc   :  { %v1978_v45 = vpop.eup %1977  ;;  %v1315_v7 = vmul.f32 %v1976_v43, %v1974_v42 }
 0x6dd   :  { %v1314_v18 = vmul.f32 %v1978_v45, %v3314_v49  ;;  %v1980_v57 = vpop.eup %1979  ;;  %v1501_v49 = vld [vmem:[%s3557_s2 + $0x18] sm:$0xff] }
 0x6de   :  { %v1762_v20 = vmul.f32 -1.442695, %v1501_v49 }
 0x6df   :  { %v3396_v63 = vadd.f32 %v1315_v7, %v1314_v18  ;;  %v1756_v18 = vld [vmem:[%s3556_s0 + $0xf0] sm:$0xff] }
 0x6e1   :  { %1981 = vtanh.f32 %v3396_v63 }
 0x6e2   :  { %1983 = vpow2.f32 %v1761_v15 }
 0x6ee   :  { %v1982_v62 = vpop.eup %1981 }
 0x6ef   :  { %v1318_v12 = vmul.f32 %v1982_v62, %v1980_v57  ;;  %v1984_v10 = vpop.eup %1983 }
 0x6f0   :  { %v1505_v61 = vadd.f32 1.0, %v1984_v10 }
 0x6f1   :  { %1389 = vmatmul.mubr.f32.vlgmr.msra.gmra.mxu0 %v1318_v12  ;;  %1460 = vmatmul.mubr.f32.vlgmr.msra.gmra.mxu1 %v1318_v12 }
 0x6f2   :  { %1985 = vrcp.f32 %v1505_v61  ;;  %1800 = vmatpush3.msra.mxu0 %v1549_v5  ;;  %1835 = vmatpush3.msra.mxu1 %v1533_v17 }
 0x6f3   :  { %1987 = vtanh.f32 %v1500_v19  ;;  %1801 = vmatprep.subr.mxu0 %v3741_v13  ;;  %1836 = vmatprep.subr.mxu1 %v3741_v13 }
 0x6f4   :  { %1989 = vpow2.f32 %v1762_v20  ;;  %1802 = vmatpush3.msra.mxu0 %v1548_v2  ;;  %1837 = vmatpush3.msra.mxu1 %v1532_v55 }
 0x6f5   :  { %1803 = vmatprep.subr.mxu0 %v3741_v13  ;;  %1838 = vmatprep.subr.mxu1 %v3741_v13 }
 0x6f6   :  { %1804 = vmatpush3.msra.mxu0 %v1547_v46  ;;  %1839 = vmatpush3.msra.mxu1 %v1531_v9 }
 0x6f7   :  { %1805 = vmatprep.subr.mxu0 %v3741_v13  ;;  %1840 = vmatprep.subr.mxu1 %v3741_v13 }
 0x6f8   :  { %1806 = vmatpush3.msra.mxu0 %v1546_v58  ;;  %1841 = vmatpush3.msra.mxu1 %v1530_v44 }
 0x6f9   :  { %1807 = vmatprep.subr.mxu0 %v3741_v13  ;;  %1842 = vmatprep.subr.mxu1 %v3741_v13 }
 0x6fa   :  { %1808 = vmatpush3.msra.mxu0 %v1545_v51  ;;  %1843 = vmatpush3.msra.mxu1 %v1529_v0  ;;  %v1763_v0 = vld [vmem:[%s3560_s5] ss:$0 sm:$0xff] }
 0x6fb   :  { %1809 = vmatprep.subr.mxu0 %v3741_v13  ;;  %1844 = vmatprep.subr.mxu1 %v3741_v13 }
 0x6fc   :  { %1810 = vmatpush3.msra.mxu0 %v1544_v16  ;;  %1845 = vmatpush3.msra.mxu1 %v1528_v56 }
 0x6fd   :  { %1811 = vmatprep.subr.mxu0 %v3741_v13  ;;  %1846 = vmatprep.subr.mxu1 %v3741_v13 }
 0x6fe   :  { %1812 = vmatpush3.msra.mxu0 %v1543_v53  ;;  %1847 = vmatpush3.msra.mxu1 %v1527_v52 }
 0x6ff   :  { %v1986_v3 = vpop.eup %1985  ;;  %1813 = vmatprep.subr.mxu0 %v3741_v13  ;;  %1848 = vmatprep.subr.mxu1 %v3741_v13 }
 0x700   :  { %v1988_v59 = vpop.eup %1987  ;;  %1814 = vmatpush3.msra.mxu0 %v1542_v54  ;;  %1849 = vmatpush3.msra.mxu1 %v1526_v50 }
 0x701   :  { %v1990_v60 = vpop.eup %1989  ;;  %v1515_v1 = vmul.f32 %v1988_v59, %v1986_v3  ;;  %1815 = vmatprep.subr.mxu0 %v3741_v13  ;;  %1850 = vmatprep.subr.mxu1 %v3741_v13 }
 0x702   :  { %v1512_v8 = vadd.f32 1.0, %v1990_v60  ;;  %1816 = vmatpush3.msra.mxu0 %v1541_v48  ;;  %1851 = vmatpush3.msra.mxu1 %v1525_v6 }
 0x703   :  { %1991 = vtanh.f32 %v1515_v1  ;;  %1817 = vmatprep.subr.mxu0 %v3741_v13  ;;  %1852 = vmatprep.subr.mxu1 %v3741_v13 }
 0x704   :  { %1993 = vrcp.f32 %v1512_v8  ;;  %1818 = vmatpush3.msra.mxu0 %v1540_v4  ;;  %1853 = vmatpush3.msra.mxu1 %v1524_v21 }
 0x705   :  { %1819 = vmatprep.subr.mxu0 %v3741_v13  ;;  %1854 = vmatprep.subr.mxu1 %v3741_v13 }
 0x706   :  { %1820 = vmatpush3.msra.mxu0 %v1539_v11  ;;  %1855 = vmatpush3.msra.mxu1 %v1523_v23 }
 0x707   :  { %1821 = vmatprep.subr.mxu0 %v3741_v13  ;;  %1856 = vmatprep.subr.mxu1 %v3741_v13 }
 0x708   :  { %1822 = vmatpush3.msra.mxu0 %v1538_v22  ;;  %1857 = vmatpush3.msra.mxu1 %v1522_v25 }
 0x709   :  { %1823 = vmatprep.subr.mxu0 %v3741_v13  ;;  %1858 = vmatprep.subr.mxu1 %v3741_v13 }
 0x70a   :  { %1824 = vmatpush3.msra.mxu0 %v1537_v24  ;;  %1859 = vmatpush3.msra.mxu1 %v1521_v27 }
 0x70b   :  { %1825 = vmatprep.subr.mxu0 %v3741_v13  ;;  %1860 = vmatprep.subr.mxu1 %v3741_v13 }
 0x70c   :  { %1826 = vmatpush3.msra.mxu0 %v1536_v26  ;;  %1861 = vmatpush3.msra.mxu1 %v1520_v29 }
 0x70d   :  { %1827 = vmatprep.subr.mxu0 %v3741_v13  ;;  %1862 = vmatprep.subr.mxu1 %v3741_v13 }
 0x70e   :  { %1828 = vmatpush3.msra.mxu0 %v1535_v28  ;;  %1831 = vmatprep.mubr.msk.f32.mxu0 %vm2080_vm0, %v3741_v13 }
 0x70f   :  { %1829 = vmatprep.subr.mxu0 %v3741_v13  ;;  %1863 = vmatpush3.msra.mxu1 %v1519_v31 }
 0x710   :  { %v1992_v32 = vpop.eup %1991  ;;  %1830 = vmatpush3.msra.mxu0 %v1534_v30  ;;  %1866 = vmatprep.mubr.msk.f32.mxu1 %vm2080_vm0, %v3741_v13 }
 0x711   :  { %v1994_v33 = vpop.eup %1993  ;;  %1864 = vmatprep.subr.mxu1 %v3741_v13  ;;  %v1757_v13 = vld [vmem:[%s3556_s0 + $0xf8] sm:$0xff] }
 0x712   :  { %v1517_v35 = vmul.f32 %v1994_v33, %v1992_v32  ;;  %1865 = vmatpush3.msra.mxu1 %v1518_v34 }
 0x714   :  { %1832 = vmatmul.mubr.f32.vlgmr.msra.gmra.mxu0 %v1517_v35 }
 0x7b1   :  { %v1390_v37 = vpop.f32.mrf.mxu0  ;;  %v1461_v43 = vpop.f32.mrf.mxu1 }
 0x7b2   :  { %v1466_v39 = vadd.f32 %v1754_v36, %v1390_v37  ;;  %v1468_v12 = vadd.f32 %v1756_v18, %v1461_v43 }
 0x7b3   :  { %v1392_v40 = vpop.f32.mrf.mxu0  ;;  %v1463_v47 = vpop.f32.mrf.mxu1 }
 0x7b4   :  { %v1758_v41 = vmul.f32 -1.442695, %v1466_v39  ;;  %v1467_v42 = vadd.f32 %v1755_v38, %v1392_v40  ;;  %v1469_v7 = vadd.f32 %v1757_v13, %v1463_v47 }
 0x7b6   :  { %1995 = vpow2.f32 %v1758_v41  ;;  %v1759_v45 = vmul.f32 -1.442695, %v1467_v42  ;;  %v1760_v57 = vmul.f32 -1.442695, %v1469_v7 }
 0x7b8   :  { %1997 = vpow2.f32 %v1759_v45 }
 0x7b9   :  { %1999 = vpow2.f32 %v1760_v57 }
 0x7c3   :  { %v1996_v62 = vpop.eup %1995 }
 0x7c4   :  { %v1473_v14 = vadd.f32 1.0, %v1996_v62 }
 0x7c5   :  { %v1998_v15 = vpop.eup %1997 }
 0x7c6   :  { %2001 = vrcp.f32 %v1473_v14  ;;  %v1479_v10 = vadd.f32 1.0, %v1998_v15  ;;  %v2000_v49 = vpop.eup %1999 }
 0x7c7   :  { %2003 = vtanh.f32 %v1468_v12  ;;  %v1486_v5 = vadd.f32 1.0, %v2000_v49 }
 0x7c8   :  { %2005 = vrcp.f32 %v1479_v10 }
 0x7c9   :  { %2007 = vrcp.f32 %v1486_v5 }
 0x7d3   :  { %v2002_v61 = vpop.eup %2001 }
 0x7d4   :  { %v2004_v20 = vpop.eup %2003  ;;  %v1616_v51 = vpop.f32.mrf.mxu0 }
 0x7d5   :  { %v2006_v19 = vpop.eup %2005  ;;  %v1490_v2 = vmul.f32 %v2004_v20, %v2002_v61 }
 0x7d6   :  { %v1489_v17 = vmul.f32 %v2006_v19, %v3396_v63  ;;  %v2008_v55 = vpop.eup %2007  ;;  %v1833_v44 = vpop.f32.mrf.mxu0 }
 0x7d8   :  { %v1491_v46 = vadd.f32 %v1490_v2, %v1489_v17 }
 0x7da   :  { %2009 = vtanh.f32 %v1491_v46 }
 0x7e7   :  { %v2010_v58 = vpop.eup %2009 }
 0x7e8   :  { %v1493_v9 = vmul.f32 %v2010_v58, %v2008_v55 }
 0x7ea   :  { %1867 = vmatmul.mubr.f32.vlgmr.msra.gmra.mxu1 %v1493_v9 }
 0x8aa   :  { %v1686_v16 = vpop.f32.mrf.mxu1 }
 0x8ab   :  { %v1687_v53 = vadd.f32 %v1686_v16, %v1616_v51 }
 0x8ac   :  { %v1868_v56 = vpop.f32.mrf.mxu1 }
 0x8ad   :  { %v1697_v3 = vadd.f32 %v1763_v0, %v1687_v53 }
 0x8af   :  { %v1764_v59 = vmul.f32 -1.442695, %v1697_v3 }
 0x8b1   :  { %2011 = vpow2.f32 %v1764_v59 }
 0x8be   :  { %v2012_v63 = vpop.eup %2011 }
 0x8bf   :  { %v1701_v54 = vadd.f32 1.0, %v2012_v63 }
 0x8c1   :  { %2013 = vrcp.f32 %v1701_v54 }
 0x8ce   :  { %v2014_v52 = vpop.eup %2013 }
 0x8cf   :  { %1704 = vst [vmem:[%s3561_s6] sm:$0xff] %v2014_v52 }

</bundles_post_ra>
